<compile_context>
chip_gen: v5e
topology: v5e:2x2
jax: 0.10.0
libtpu: 0.0.40
codegen_flags: <defaults>
</compile_context>

<pallas_src>
import functools
import math

import jax
import jax.numpy as jnp
from jax.experimental import pallas as pl
from jax.experimental.pallas import tpu as pltpu


# ---------------------------------------------------------------------------
# Pallas kernel: four chained (block-matmul -> +bias -> ReLU) stages on one row tile.
# ---------------------------------------------------------------------------
def _make_decoder_kernel(layer_meta):
    """layer_meta[l] = (n_blocks, cin_blk): layer l's weight is the block-diagonal
    unit kron(I_g_sub, W_l) of K = cin_blk; it is applied to n_blocks consecutive
    column chunks of the running activation (chunk order preserves the
    (a1,b1,...,al,bl,co) column ordering exactly)."""

    def kernel(x_ref, w1_ref, w2_ref, w3_ref, w4_ref,
               b1_ref, b2_ref, b3_ref, b4_ref, o_ref):
        w_refs = (w1_ref, w2_ref, w3_ref, w4_ref)
        b_refs = (b1_ref, b2_ref, b3_ref, b4_ref)
        h = x_ref[...]                                       # (tm, C0) bf16
        for w_ref, b_ref, (n_blocks, cin_blk) in zip(w_refs, b_refs, layer_meta):
            w = w_ref[...]
            if n_blocks == 1:
                acc = jnp.dot(h, w, preferred_element_type=jnp.float32)
            else:
                # Static, lane-aligned chunks (cin_blk is a multiple of 128 here).
                acc = jnp.concatenate(
                    [jnp.dot(h[:, j * cin_blk:(j + 1) * cin_blk], w,
                             preferred_element_type=jnp.float32)
                     for j in range(n_blocks)], axis=1)
            h = jnp.maximum(acc + b_ref[...], 0.0).astype(jnp.bfloat16)  # BN bias + ReLU
        o_ref[...] = h.astype(o_ref.dtype)                   # bf16 store (lane-dense)

    return kernel


# ---------------------------------------------------------------------------
# Tiling / VMEM helpers.
# ---------------------------------------------------------------------------
def _default_tm_max():
    """1024-row tiles on 128-MiB-VMEM chips (v5e/v6e); 512 on v7x (64 MiB)."""
    try:
        if pltpu.get_tpu_info().vmem_capacity_bytes >= 100 * 2 ** 20:
            return 1024
    except Exception:
        pass
    return 512


def _choose_tm(m, tm_max):
    """Large row tiles (toward the HBM roofline), but >= 4 grid steps when M allows
    so the 'parallel' axis gives >= 2 steps per v7x TensorCore; multiple of 16 for
    bf16 (16,128) sublane packing."""
    tm = min(tm_max, max(m, 16))
    if m >= 4 * 32:
        tm = min(tm, pl.cdiv(m, 4))
    return max(16, ((tm + 15) // 16) * 16)


def _vmem_limit_bytes(tm, c0, out_width, fused_w, fused_b, single_buffer):
    """Scoped-VMEM limit from the actual per-tile footprint + headroom (v7x-safe)."""
    w_bytes = sum(int(w.size) for w in fused_w) * 2          # bf16 weights
    b_bytes = sum(int(b.size) for b in fused_b) * 4          # f32 biases
    const_mult = 1 if single_buffer else 2                   # default is double-buffered
    x_bytes = 2 * tm * c0 * 2                                 # in tile, double-buffered bf16
    o_bytes = 2 * tm * out_width * 2                          # out tile, double-buffered bf16
    live_bytes = 3 * tm * out_width * 4                       # f32 intermediates (generous)
    need = x_bytes + o_bytes + const_mult * (w_bytes + b_bytes) + live_bytes
    return int(min(48 * 2 ** 20, max(16 * 2 ** 20, 2 * need)))


# ---------------------------------------------------------------------------
# Parameter preparation: fold eval-mode BN, reorder columns to (a,b,co), and build
# a capped block-diagonal weight per layer (K = g_sub*Cin <= kmax; no giant kron).
# ---------------------------------------------------------------------------
def prepare_decoder_params(params, kmax=128):
    fused_w, fused_b = [], []
    g_in = 1
    for (w_t, scale, bias) in params:                         # w_t: (Cin, Cout, 2, 2)
        cin, cout, kh, kw = w_t.shape
        sub = kh * kw                                         # 4 sub-pixels
        w2d = jnp.transpose(w_t, (0, 2, 3, 1)).reshape(cin, sub * cout)
        w2d = w2d * jnp.tile(scale, sub)[None, :]             # fold BN scale into weights
        # Largest divisor of g_in keeping the matmul K within kmax (MXU-native width).
        g_sub = 1
        for d in range(1, g_in + 1):
            if g_in % d == 0 and d * cin <= kmax:
                g_sub = d
        wblk = jnp.kron(jnp.eye(g_sub, dtype=w2d.dtype), w2d)  # (g_sub*Cin, g_sub*4*Cout)
        bfull = jnp.tile(jnp.tile(bias, sub), g_in)             # bias depends only on co
        fused_w.append(wblk.astype(jnp.bfloat16))
        fused_b.append(bfull.reshape(1, -1).astype(jnp.float32))
        g_in *= sub
    return fused_w, fused_b


# ---------------------------------------------------------------------------
# Forward pass.
# ---------------------------------------------------------------------------
def decoder_forward(x_nchw, fused_w, fused_b, *, tm_max=None,
                    single_buffer_weights=True, out_dtype=jnp.bfloat16):
    """Decoder.forward: x -> layer1 -> layer2 -> layer3 -> layer4 (NCHW in/out)."""
    n, c0, h, w = x_nchw.shape
    out_width = int(fused_b[-1].shape[1])                     # 256 * C4 == 16 * C0
    c_out = out_width // 256
    m = n * h * w

    if tm_max is None:
        tm_max = _default_tm_max()
    tm = _choose_tm(m, tm_max)
    grid_m = pl.cdiv(m, tm)
    m_pad = grid_m * tm

    # NCHW -> NHWC -> (M, C0) rows; bf16 halves HBM read traffic of activations.
    x2d = jnp.transpose(x_nchw, (0, 2, 3, 1)).reshape(m, c0).astype(jnp.bfloat16)
    if m_pad != m:
        x2d = jnp.pad(x2d, ((0, m_pad - m), (0, 0)))          # padded rows discarded below

    # Static per-layer block structure (derived from static shapes).
    in_widths = [c0] + [int(b.shape[1]) for b in fused_b[:-1]]
    meta = tuple((in_widths[l] // int(fused_w[l].shape[0]), int(fused_w[l].shape[0]))
                 for l in range(len(fused_w)))

    # Constant weight/bias blocks: DMA'd once; single-buffer them to save VMEM.
    const_mode = pl.Buffered(1) if single_buffer_weights else None

    def const_spec(shape):
        if const_mode is None:
            return pl.BlockSpec(shape, lambda i: (0, 0))
        return pl.BlockSpec(shape, lambda i: (0, 0), pipeline_mode=const_mode)

    in_specs = [pl.BlockSpec((tm, c0), lambda i: (i, 0))]
    in_specs += [const_spec(wl.shape) for wl in fused_w]
    in_specs += [const_spec(bl.shape) for bl in fused_b]

    out2d = pl.pallas_call(
        _make_decoder_kernel(meta),
        out_shape=jax.ShapeDtypeStruct((m_pad, out_width), jnp.bfloat16),
        grid_spec=pltpu.PrefetchScalarGridSpec(
            num_scalar_prefetch=0,
            grid=(grid_m,),
            in_specs=in_specs,
            out_specs=pl.BlockSpec((tm, out_width), lambda i: (i, 0)),
        ),
        compiler_params=pltpu.CompilerParams(
            dimension_semantics=("parallel",),
            vmem_limit_bytes=_vmem_limit_bytes(tm, c0, out_width, fused_w, fused_b,
                                               single_buffer_weights),
        ),
    )(x2d, *fused_w, *fused_b)

    out2d = out2d[:m]                                          # bf16 all the way
    # Columns are ordered (a1,b1,a2,b2,a3,b3,a4,b4,c); rows are (n,i,j).
    # TODO(synk): fusing this 2^4x2^4 depth-to-space into the kernel (writing NCHW
    # blocks directly) would remove one HBM round-trip but needs an in-kernel
    # lane->sublane relayout; left to one XLA transpose (now bf16, half the bytes).
    y = out2d.reshape(n, h, w, 2, 2, 2, 2, 2, 2, 2, 2, c_out)
    #   out[n, c, 16i+8a1+4a2+2a3+a4, 16j+8b1+4b2+2b3+b4]
    y = jnp.transpose(y, (0, 11, 1, 3, 5, 7, 9, 2, 4, 6, 8, 10))
    y = y.reshape(n, c_out, 16 * h, 16 * w)
    return y.astype(out_dtype)


# ---------------------------------------------------------------------------
# Parameter init (synthetic, deterministic) and a pure-JAX f32 reference.
# ---------------------------------------------------------------------------
def init_decoder_params(key, in_channels):
    """Synthetic params for the 4 'deconv2' layers (eval-mode BN folded)."""
    params = []
    c = in_channels
    eps = 1e-5
    for _ in range(4):
        c_out = c // 2
        key, wk, gk, bk, mk, vk = jax.random.split(key, 6)
        bound = 1.0 / math.sqrt(c * 2 * 2)
        w = jax.random.uniform(wk, (c, c_out, 2, 2), jnp.float32, -bound, bound)
        gamma = 1.0 + 0.1 * jax.random.normal(gk, (c_out,), jnp.float32)
        beta = 0.1 * jax.random.normal(bk, (c_out,), jnp.float32)
        mean = 0.05 * jax.random.normal(mk, (c_out,), jnp.float32)
        var = jnp.abs(1.0 + 0.1 * jax.random.normal(vk, (c_out,), jnp.float32))
        scale = gamma / jnp.sqrt(var + eps)
        bias = beta - mean * scale
        params.append((w, scale, bias))
        c = c_out
    return params


def decoder_reference(x_nchw, params):
    """Plain-JAX f32 reference of the per-layer deconv2 + BN + ReLU decoder."""
    x = jnp.transpose(x_nchw, (0, 2, 3, 1)).astype(jnp.float32)   # NCHW -> NHWC
    for (w_t, scale, bias) in params:
        n, h, w, _ = x.shape
        c_out = w_t.shape[1]
        y = jnp.einsum('nhwc,cdab->nhwdab', x, w_t,
                       preferred_element_type=jnp.float32)
        y = y * scale[None, None, None, :, None, None] \
            + bias[None, None, None, :, None, None]
        y = jnp.maximum(y, 0.0)
        x = jnp.transpose(y, (0, 1, 4, 2, 5, 3)).reshape(n, 2 * h, 2 * w, c_out)
    return jnp.transpose(x, (0, 3, 1, 2))                         # NHWC -> NCHW


if __name__ == "__main__":
    key = jax.random.PRNGKey(0)
    key, xk = jax.random.split(key)

    # Small FCRN-decoder-like shapes: channels halve, spatial doubles, per layer.
    N, C0, H, W = 2, 64, 8, 8
    x = jax.random.normal(xk, (N, C0, H, W), jnp.float32)

    params = init_decoder_params(key, C0)
    fused_w, fused_b = prepare_decoder_params(params)

    ref = decoder_reference(x, params)
    expected_shape = (N, C0 // 16, H * 16, W * 16)    # 4 layers of /2 ch, x2 spatial
    tol = 1e-3 + 3e-2 * float(jnp.max(jnp.abs(ref)))  # bf16 matmul chain + bf16 store

    def run_and_check(single_buffer_weights):
        fwd = jax.jit(functools.partial(decoder_forward,
                                        single_buffer_weights=single_buffer_weights))
        out = jax.block_until_ready(fwd(x, fused_w, fused_b))
        assert out.shape == expected_shape, (out.shape, expected_shape)
        out_f32 = jnp.asarray(out, jnp.float32)
        assert bool(jnp.all(out_f32 >= 0.0))          # ReLU output
        assert bool(jnp.all(jnp.isfinite(out_f32)))
        max_err = float(jnp.max(jnp.abs(out_f32 - ref)))
        assert max_err <= tol, (max_err, tol)
        return out

    try:
        out = run_and_check(True)
    except Exception:
        # Fallback if single-buffered constant blocks (pipeline_mode=pl.Buffered(1))
        # are not supported on this JAX build: use default double-buffering.
        out = run_and_check(False)

    print("KERNEL_OK")
</pallas_src>

<mosaic_0001>
module attributes {stable_mosaic.version = 11 : i64} {
  func.func @kernel(%arg0: i32, %arg1: memref<32x64xbf16, #tpu.memory_space<vmem>>, %arg2: memref<64x128xbf16, #tpu.memory_space<vmem>>, %arg3: memref<128x256xbf16, #tpu.memory_space<vmem>>, %arg4: memref<128x256xbf16, #tpu.memory_space<vmem>>, %arg5: memref<128x256xbf16, #tpu.memory_space<vmem>>, %arg6: memref<1x128xf32, #tpu.memory_space<vmem>>, %arg7: memref<1x256xf32, #tpu.memory_space<vmem>>, %arg8: memref<1x512xf32, #tpu.memory_space<vmem>>, %arg9: memref<1x1024xf32, #tpu.memory_space<vmem>>, %arg10: memref<32x1024xbf16, #tpu.memory_space<vmem>>) attributes {dimension_semantics = [#tpu.dimension_semantics<parallel>], iteration_bounds = array<i64: 4>, scalar_prefetch = 0 : i64, scratch_operands = 0 : i64, tpu.core_type = #tpu.core_type<tc>, window_params = [{transform_indices = @transform_0, window_bounds = array<i64: 32, 64>}, {pipeline_mode = #tpu.pipeline_mode<synchronous>, transform_indices = @transform_1, window_bounds = array<i64: 64, 128>}, {pipeline_mode = #tpu.pipeline_mode<synchronous>, transform_indices = @transform_2, window_bounds = array<i64: 128, 256>}, {pipeline_mode = #tpu.pipeline_mode<synchronous>, transform_indices = @transform_3, window_bounds = array<i64: 128, 256>}, {pipeline_mode = #tpu.pipeline_mode<synchronous>, transform_indices = @transform_4, window_bounds = array<i64: 128, 256>}, {pipeline_mode = #tpu.pipeline_mode<synchronous>, transform_indices = @transform_5, window_bounds = array<i64: 1, 128>}, {pipeline_mode = #tpu.pipeline_mode<synchronous>, transform_indices = @transform_6, window_bounds = array<i64: 1, 256>}, {pipeline_mode = #tpu.pipeline_mode<synchronous>, transform_indices = @transform_7, window_bounds = array<i64: 1, 512>}, {pipeline_mode = #tpu.pipeline_mode<synchronous>, transform_indices = @transform_8, window_bounds = array<i64: 1, 1024>}, {transform_indices = @transform_9, window_bounds = array<i64: 32, 1024>}]} {
    %c0 = arith.constant 0 : index
    %c0_0 = arith.constant 0 : index
    %0 = vector.load %arg1[%c0, %c0_0] : memref<32x64xbf16, #tpu.memory_space<vmem>>, vector<32x64xbf16>
    %c0_1 = arith.constant 0 : index
    %c0_2 = arith.constant 0 : index
    %1 = vector.load %arg2[%c0_1, %c0_2] : memref<64x128xbf16, #tpu.memory_space<vmem>>, vector<64x128xbf16>
    %cst = arith.constant dense<0.000000e+00> : vector<32x128xf32>
    %2 = tpu.matmul %0, %1, %cst {dimension_numbers = #tpu.dot_dimension_numbers<[1], [0], [0], [1], [0, 0, 1, 1], [], []>} : vector<32x64xbf16>, vector<64x128xbf16>, vector<32x128xf32> -> vector<32x128xf32>
    %c0_3 = arith.constant 0 : index
    %c0_4 = arith.constant 0 : index
    %3 = vector.load %arg6[%c0_3, %c0_4] : memref<1x128xf32, #tpu.memory_space<vmem>>, vector<1x128xf32>
    %4 = vector.broadcast %3 : vector<1x128xf32> to vector<32x128xf32>
    %5 = arith.addf %2, %4 : vector<32x128xf32>
    %cst_5 = arith.constant 0.000000e+00 : f32
    %6 = vector.broadcast %cst_5 : f32 to vector<32x128xf32>
    %7 = arith.maximumf %5, %6 : vector<32x128xf32>
    %8 = arith.truncf %7 : vector<32x128xf32> to vector<32x128xbf16>
    %c0_6 = arith.constant 0 : index
    %c0_7 = arith.constant 0 : index
    %9 = vector.load %arg3[%c0_6, %c0_7] : memref<128x256xbf16, #tpu.memory_space<vmem>>, vector<128x256xbf16>
    %cst_8 = arith.constant dense<0.000000e+00> : vector<32x256xf32>
    %10 = tpu.matmul %8, %9, %cst_8 {dimension_numbers = #tpu.dot_dimension_numbers<[1], [0], [0], [1], [0, 0, 1, 1], [], []>} : vector<32x128xbf16>, vector<128x256xbf16>, vector<32x256xf32> -> vector<32x256xf32>
    %c0_9 = arith.constant 0 : index
    %c0_10 = arith.constant 0 : index
    %11 = vector.load %arg7[%c0_9, %c0_10] : memref<1x256xf32, #tpu.memory_space<vmem>>, vector<1x256xf32>
    %12 = vector.broadcast %11 : vector<1x256xf32> to vector<32x256xf32>
    %13 = arith.addf %10, %12 : vector<32x256xf32>
    %cst_11 = arith.constant 0.000000e+00 : f32
    %14 = vector.broadcast %cst_11 : f32 to vector<32x256xf32>
    %15 = arith.maximumf %13, %14 : vector<32x256xf32>
    %16 = arith.truncf %15 : vector<32x256xf32> to vector<32x256xbf16>
    %c0_12 = arith.constant 0 : index
    %c0_13 = arith.constant 0 : index
    %17 = vector.load %arg4[%c0_12, %c0_13] : memref<128x256xbf16, #tpu.memory_space<vmem>>, vector<128x256xbf16>
    %18 = vector.extract_strided_slice %16 {offsets = [0, 0], sizes = [32, 128], strides = [1, 1]} : vector<32x256xbf16> to vector<32x128xbf16>
    %cst_14 = arith.constant dense<0.000000e+00> : vector<32x256xf32>
    %19 = tpu.matmul %18, %17, %cst_14 {dimension_numbers = #tpu.dot_dimension_numbers<[1], [0], [0], [1], [0, 0, 1, 1], [], []>} : vector<32x128xbf16>, vector<128x256xbf16>, vector<32x256xf32> -> vector<32x256xf32>
    %20 = vector.extract_strided_slice %16 {offsets = [0, 128], sizes = [32, 128], strides = [1, 1]} : vector<32x256xbf16> to vector<32x128xbf16>
    %cst_15 = arith.constant dense<0.000000e+00> : vector<32x256xf32>
    %21 = tpu.matmul %20, %17, %cst_15 {dimension_numbers = #tpu.dot_dimension_numbers<[1], [0], [0], [1], [0, 0, 1, 1], [], []>} : vector<32x128xbf16>, vector<128x256xbf16>, vector<32x256xf32> -> vector<32x256xf32>
    %22 = tpu.concatenate %19, %21 in 1 : vector<32x256xf32>, vector<32x256xf32> -> vector<32x512xf32>
    %c0_16 = arith.constant 0 : index
    %c0_17 = arith.constant 0 : index
    %23 = vector.load %arg8[%c0_16, %c0_17] : memref<1x512xf32, #tpu.memory_space<vmem>>, vector<1x512xf32>
    %24 = vector.broadcast %23 : vector<1x512xf32> to vector<32x512xf32>
    %25 = arith.addf %22, %24 : vector<32x512xf32>
    %cst_18 = arith.constant 0.000000e+00 : f32
    %26 = vector.broadcast %cst_18 : f32 to vector<32x512xf32>
    %27 = arith.maximumf %25, %26 : vector<32x512xf32>
    %28 = arith.truncf %27 : vector<32x512xf32> to vector<32x512xbf16>
    %c0_19 = arith.constant 0 : index
    %c0_20 = arith.constant 0 : index
    %29 = vector.load %arg5[%c0_19, %c0_20] : memref<128x256xbf16, #tpu.memory_space<vmem>>, vector<128x256xbf16>
    %30 = vector.extract_strided_slice %28 {offsets = [0, 0], sizes = [32, 128], strides = [1, 1]} : vector<32x512xbf16> to vector<32x128xbf16>
    %cst_21 = arith.constant dense<0.000000e+00> : vector<32x256xf32>
    %31 = tpu.matmul %30, %29, %cst_21 {dimension_numbers = #tpu.dot_dimension_numbers<[1], [0], [0], [1], [0, 0, 1, 1], [], []>} : vector<32x128xbf16>, vector<128x256xbf16>, vector<32x256xf32> -> vector<32x256xf32>
    %32 = vector.extract_strided_slice %28 {offsets = [0, 128], sizes = [32, 128], strides = [1, 1]} : vector<32x512xbf16> to vector<32x128xbf16>
    %cst_22 = arith.constant dense<0.000000e+00> : vector<32x256xf32>
    %33 = tpu.matmul %32, %29, %cst_22 {dimension_numbers = #tpu.dot_dimension_numbers<[1], [0], [0], [1], [0, 0, 1, 1], [], []>} : vector<32x128xbf16>, vector<128x256xbf16>, vector<32x256xf32> -> vector<32x256xf32>
    %34 = vector.extract_strided_slice %28 {offsets = [0, 256], sizes = [32, 128], strides = [1, 1]} : vector<32x512xbf16> to vector<32x128xbf16>
    %cst_23 = arith.constant dense<0.000000e+00> : vector<32x256xf32>
    %35 = tpu.matmul %34, %29, %cst_23 {dimension_numbers = #tpu.dot_dimension_numbers<[1], [0], [0], [1], [0, 0, 1, 1], [], []>} : vector<32x128xbf16>, vector<128x256xbf16>, vector<32x256xf32> -> vector<32x256xf32>
    %36 = vector.extract_strided_slice %28 {offsets = [0, 384], sizes = [32, 128], strides = [1, 1]} : vector<32x512xbf16> to vector<32x128xbf16>
    %cst_24 = arith.constant dense<0.000000e+00> : vector<32x256xf32>
    %37 = tpu.matmul %36, %29, %cst_24 {dimension_numbers = #tpu.dot_dimension_numbers<[1], [0], [0], [1], [0, 0, 1, 1], [], []>} : vector<32x128xbf16>, vector<128x256xbf16>, vector<32x256xf32> -> vector<32x256xf32>
    %38 = tpu.concatenate %31, %33, %35, %37 in 1 : vector<32x256xf32>, vector<32x256xf32>, vector<32x256xf32>, vector<32x256xf32> -> vector<32x1024xf32>
    %c0_25 = arith.constant 0 : index
    %c0_26 = arith.constant 0 : index
    %39 = vector.load %arg9[%c0_25, %c0_26] : memref<1x1024xf32, #tpu.memory_space<vmem>>, vector<1x1024xf32>
    %40 = vector.broadcast %39 : vector<1x1024xf32> to vector<32x1024xf32>
    %41 = arith.addf %38, %40 : vector<32x1024xf32>
    %cst_27 = arith.constant 0.000000e+00 : f32
    %42 = vector.broadcast %cst_27 : f32 to vector<32x1024xf32>
    %43 = arith.maximumf %41, %42 : vector<32x1024xf32>
    %44 = arith.truncf %43 : vector<32x1024xf32> to vector<32x1024xbf16>
    %c0_28 = arith.constant 0 : index
    %c0_29 = arith.constant 0 : index
    %45 = vector.load %arg10[%c0_28, %c0_29] : memref<32x1024xbf16, #tpu.memory_space<vmem>>, vector<32x1024xbf16>
    tpu.vector_store %arg10[%c0_28, %c0_29], %44 {strides = array<i32>} : memref<32x1024xbf16, #tpu.memory_space<vmem>>, vector<32x1024xbf16>,
    return
  }
  func.func @transform_0(%arg0: i32) -> (i32, i32) {
    %c0_i32 = arith.constant 0 : i32
    %c0_i32_0 = arith.constant 0 : i32
    return %arg0, %c0_i32 : i32, i32
  }
  func.func @transform_1(%arg0: i32) -> (i32, i32) {
    %c0_i32 = arith.constant 0 : i32
    %c0_i32_0 = arith.constant 0 : i32
    %c0_i32_1 = arith.constant 0 : i32
    return %c0_i32, %c0_i32_0 : i32, i32
  }
  func.func @transform_2(%arg0: i32) -> (i32, i32) {
    %c0_i32 = arith.constant 0 : i32
    %c0_i32_0 = arith.constant 0 : i32
    %c0_i32_1 = arith.constant 0 : i32
    return %c0_i32, %c0_i32_0 : i32, i32
  }
  func.func @transform_3(%arg0: i32) -> (i32, i32) {
    %c0_i32 = arith.constant 0 : i32
    %c0_i32_0 = arith.constant 0 : i32
    %c0_i32_1 = arith.constant 0 : i32
    return %c0_i32, %c0_i32_0 : i32, i32
  }
  func.func @transform_4(%arg0: i32) -> (i32, i32) {
    %c0_i32 = arith.constant 0 : i32
    %c0_i32_0 = arith.constant 0 : i32
    %c0_i32_1 = arith.constant 0 : i32
    return %c0_i32, %c0_i32_0 : i32, i32
  }
  func.func @transform_5(%arg0: i32) -> (i32, i32) {
    %c0_i32 = arith.constant 0 : i32
    %c0_i32_0 = arith.constant 0 : i32
    %c0_i32_1 = arith.constant 0 : i32
    return %c0_i32, %c0_i32_0 : i32, i32
  }
  func.func @transform_6(%arg0: i32) -> (i32, i32) {
    %c0_i32 = arith.constant 0 : i32
    %c0_i32_0 = arith.constant 0 : i32
    %c0_i32_1 = arith.constant 0 : i32
    return %c0_i32, %c0_i32_0 : i32, i32
  }
  func.func @transform_7(%arg0: i32) -> (i32, i32) {
    %c0_i32 = arith.constant 0 : i32
    %c0_i32_0 = arith.constant 0 : i32
    %c0_i32_1 = arith.constant 0 : i32
    return %c0_i32, %c0_i32_0 : i32, i32
  }
  func.func @transform_8(%arg0: i32) -> (i32, i32) {
    %c0_i32 = arith.constant 0 : i32
    %c0_i32_0 = arith.constant 0 : i32
    %c0_i32_1 = arith.constant 0 : i32
    return %c0_i32, %c0_i32_0 : i32, i32
  }
  func.func @transform_9(%arg0: i32) -> (i32, i32) {
    %c0_i32 = arith.constant 0 : i32
    %c0_i32_0 = arith.constant 0 : i32
    return %arg0, %c0_i32 : i32, i32
  }
}

module attributes {stable_mosaic.version = 11 : i64} {
  func.func @kernel(%arg0: i32, %arg1: memref<32x64xbf16, #tpu.memory_space<vmem>>, %arg2: memref<64x128xbf16, #tpu.memory_space<vmem>>, %arg3: memref<128x256xbf16, #tpu.memory_space<vmem>>, %arg4: memref<128x256xbf16, #tpu.memory_space<vmem>>, %arg5: memref<128x256xbf16, #tpu.memory_space<vmem>>, %arg6: memref<1x128xf32, #tpu.memory_space<vmem>>, %arg7: memref<1x256xf32, #tpu.memory_space<vmem>>, %arg8: memref<1x512xf32, #tpu.memory_space<vmem>>, %arg9: memref<1x1024xf32, #tpu.memory_space<vmem>>, %arg10: memref<32x1024xbf16, #tpu.memory_space<vmem>>) attributes {dimension_semantics = [#tpu.dimension_semantics<parallel>], iteration_bounds = array<i64: 4>, scalar_prefetch = 0 : i64, scratch_operands = 0 : i64, tpu.core_type = #tpu.core_type<tc>, window_params = [{transform_indices = @transform_0, window_bounds = array<i64: 32, 64>}, {pipeline_mode = #tpu.pipeline_mode<synchronous>, transform_indices = @transform_1, window_bounds = array<i64: 64, 128>}, {pipeline_mode = #tpu.pipeline_mode<synchronous>, transform_indices = @transform_2, window_bounds = array<i64: 128, 256>}, {pipeline_mode = #tpu.pipeline_mode<synchronous>, transform_indices = @transform_3, window_bounds = array<i64: 128, 256>}, {pipeline_mode = #tpu.pipeline_mode<synchronous>, transform_indices = @transform_4, window_bounds = array<i64: 128, 256>}, {pipeline_mode = #tpu.pipeline_mode<synchronous>, transform_indices = @transform_5, window_bounds = array<i64: 1, 128>}, {pipeline_mode = #tpu.pipeline_mode<synchronous>, transform_indices = @transform_6, window_bounds = array<i64: 1, 256>}, {pipeline_mode = #tpu.pipeline_mode<synchronous>, transform_indices = @transform_7, window_bounds = array<i64: 1, 512>}, {pipeline_mode = #tpu.pipeline_mode<synchronous>, transform_indices = @transform_8, window_bounds = array<i64: 1, 1024>}, {transform_indices = @transform_9, window_bounds = array<i64: 32, 1024>}]} {
    %c0 = arith.constant 0 : index
    %c0_0 = arith.constant 0 : index
    %0 = vector.load %arg1[%c0, %c0_0] : memref<32x64xbf16, #tpu.memory_space<vmem>>, vector<32x64xbf16>
    %c0_1 = arith.constant 0 : index
    %c0_2 = arith.constant 0 : index
    %1 = vector.load %arg2[%c0_1, %c0_2] : memref<64x128xbf16, #tpu.memory_space<vmem>>, vector<64x128xbf16>
    %cst = arith.constant dense<0.000000e+00> : vector<32x128xf32>
    %2 = tpu.matmul %0, %1, %cst {dimension_numbers = #tpu.dot_dimension_numbers<[1], [0], [0], [1], [0, 0, 1, 1], [], []>} : vector<32x64xbf16>, vector<64x128xbf16>, vector<32x128xf32> -> vector<32x128xf32>
    %c0_3 = arith.constant 0 : index
    %c0_4 = arith.constant 0 : index
    %3 = vector.load %arg6[%c0_3, %c0_4] : memref<1x128xf32, #tpu.memory_space<vmem>>, vector<1x128xf32>
    %4 = vector.broadcast %3 : vector<1x128xf32> to vector<32x128xf32>
    %5 = arith.addf %2, %4 : vector<32x128xf32>
    %cst_5 = arith.constant 0.000000e+00 : f32
    %6 = vector.broadcast %cst_5 : f32 to vector<32x128xf32>
    %7 = arith.maximumf %5, %6 : vector<32x128xf32>
    %8 = arith.truncf %7 : vector<32x128xf32> to vector<32x128xbf16>
    %c0_6 = arith.constant 0 : index
    %c0_7 = arith.constant 0 : index
    %9 = vector.load %arg3[%c0_6, %c0_7] : memref<128x256xbf16, #tpu.memory_space<vmem>>, vector<128x256xbf16>
    %cst_8 = arith.constant dense<0.000000e+00> : vector<32x256xf32>
    %10 = tpu.matmul %8, %9, %cst_8 {dimension_numbers = #tpu.dot_dimension_numbers<[1], [0], [0], [1], [0, 0, 1, 1], [], []>} : vector<32x128xbf16>, vector<128x256xbf16>, vector<32x256xf32> -> vector<32x256xf32>
    %c0_9 = arith.constant 0 : index
    %c0_10 = arith.constant 0 : index
    %11 = vector.load %arg7[%c0_9, %c0_10] : memref<1x256xf32, #tpu.memory_space<vmem>>, vector<1x256xf32>
    %12 = vector.broadcast %11 : vector<1x256xf32> to vector<32x256xf32>
    %13 = arith.addf %10, %12 : vector<32x256xf32>
    %cst_11 = arith.constant 0.000000e+00 : f32
    %14 = vector.broadcast %cst_11 : f32 to vector<32x256xf32>
    %15 = arith.maximumf %13, %14 : vector<32x256xf32>
    %16 = arith.truncf %15 : vector<32x256xf32> to vector<32x256xbf16>
    %c0_12 = arith.constant 0 : index
    %c0_13 = arith.constant 0 : index
    %17 = vector.load %arg4[%c0_12, %c0_13] : memref<128x256xbf16, #tpu.memory_space<vmem>>, vector<128x256xbf16>
    %18 = vector.extract_strided_slice %16 {offsets = [0, 0], sizes = [32, 128], strides = [1, 1]} : vector<32x256xbf16> to vector<32x128xbf16>
    %cst_14 = arith.constant dense<0.000000e+00> : vector<32x256xf32>
    %19 = tpu.matmul %18, %17, %cst_14 {dimension_numbers = #tpu.dot_dimension_numbers<[1], [0], [0], [1], [0, 0, 1, 1], [], []>} : vector<32x128xbf16>, vector<128x256xbf16>, vector<32x256xf32> -> vector<32x256xf32>
    %20 = vector.extract_strided_slice %16 {offsets = [0, 128], sizes = [32, 128], strides = [1, 1]} : vector<32x256xbf16> to vector<32x128xbf16>
    %cst_15 = arith.constant dense<0.000000e+00> : vector<32x256xf32>
    %21 = tpu.matmul %20, %17, %cst_15 {dimension_numbers = #tpu.dot_dimension_numbers<[1], [0], [0], [1], [0, 0, 1, 1], [], []>} : vector<32x128xbf16>, vector<128x256xbf16>, vector<32x256xf32> -> vector<32x256xf32>
    %22 = tpu.concatenate %19, %21 in 1 : vector<32x256xf32>, vector<32x256xf32> -> vector<32x512xf32>
    %c0_16 = arith.constant 0 : index
    %c0_17 = arith.constant 0 : index
    %23 = vector.load %arg8[%c0_16, %c0_17] : memref<1x512xf32, #tpu.memory_space<vmem>>, vector<1x512xf32>
    %24 = vector.broadcast %23 : vector<1x512xf32> to vector<32x512xf32>
    %25 = arith.addf %22, %24 : vector<32x512xf32>
    %cst_18 = arith.constant 0.000000e+00 : f32
    %26 = vector.broadcast %cst_18 : f32 to vector<32x512xf32>
    %27 = arith.maximumf %25, %26 : vector<32x512xf32>
    %28 = arith.truncf %27 : vector<32x512xf32> to vector<32x512xbf16>
    %c0_19 = arith.constant 0 : index
    %c0_20 = arith.constant 0 : index
    %29 = vector.load %arg5[%c0_19, %c0_20] : memref<128x256xbf16, #tpu.memory_space<vmem>>, vector<128x256xbf16>
    %30 = vector.extract_strided_slice %28 {offsets = [0, 0], sizes = [32, 128], strides = [1, 1]} : vector<32x512xbf16> to vector<32x128xbf16>
    %cst_21 = arith.constant dense<0.000000e+00> : vector<32x256xf32>
    %31 = tpu.matmul %30, %29, %cst_21 {dimension_numbers = #tpu.dot_dimension_numbers<[1], [0], [0], [1], [0, 0, 1, 1], [], []>} : vector<32x128xbf16>, vector<128x256xbf16>, vector<32x256xf32> -> vector<32x256xf32>
    %32 = vector.extract_strided_slice %28 {offsets = [0, 128], sizes = [32, 128], strides = [1, 1]} : vector<32x512xbf16> to vector<32x128xbf16>
    %cst_22 = arith.constant dense<0.000000e+00> : vector<32x256xf32>
    %33 = tpu.matmul %32, %29, %cst_22 {dimension_numbers = #tpu.dot_dimension_numbers<[1], [0], [0], [1], [0, 0, 1, 1], [], []>} : vector<32x128xbf16>, vector<128x256xbf16>, vector<32x256xf32> -> vector<32x256xf32>
    %34 = vector.extract_strided_slice %28 {offsets = [0, 256], sizes = [32, 128], strides = [1, 1]} : vector<32x512xbf16> to vector<32x128xbf16>
    %cst_23 = arith.constant dense<0.000000e+00> : vector<32x256xf32>
    %35 = tpu.matmul %34, %29, %cst_23 {dimension_numbers = #tpu.dot_dimension_numbers<[1], [0], [0], [1], [0, 0, 1, 1], [], []>} : vector<32x128xbf16>, vector<128x256xbf16>, vector<32x256xf32> -> vector<32x256xf32>
    %36 = vector.extract_strided_slice %28 {offsets = [0, 384], sizes = [32, 128], strides = [1, 1]} : vector<32x512xbf16> to vector<32x128xbf16>
    %cst_24 = arith.constant dense<0.000000e+00> : vector<32x256xf32>
    %37 = tpu.matmul %36, %29, %cst_24 {dimension_numbers = #tpu.dot_dimension_numbers<[1], [0], [0], [1], [0, 0, 1, 1], [], []>} : vector<32x128xbf16>, vector<128x256xbf16>, vector<32x256xf32> -> vector<32x256xf32>
    %38 = tpu.concatenate %31, %33, %35, %37 in 1 : vector<32x256xf32>, vector<32x256xf32>, vector<32x256xf32>, vector<32x256xf32> -> vector<32x1024xf32>
    %c0_25 = arith.constant 0 : index
    %c0_26 = arith.constant 0 : index
    %39 = vector.load %arg9[%c0_25, %c0_26] : memref<1x1024xf32, #tpu.memory_space<vmem>>, vector<1x1024xf32>
    %40 = vector.broadcast %39 : vector<1x1024xf32> to vector<32x1024xf32>
    %41 = arith.addf %38, %40 : vector<32x1024xf32>
    %cst_27 = arith.constant 0.000000e+00 : f32
    %42 = vector.broadcast %cst_27 : f32 to vector<32x1024xf32>
    %43 = arith.maximumf %41, %42 : vector<32x1024xf32>
    %44 = arith.truncf %43 : vector<32x1024xf32> to vector<32x1024xbf16>
    %c0_28 = arith.constant 0 : index
    %c0_29 = arith.constant 0 : index
    %45 = vector.load %arg10[%c0_28, %c0_29] : memref<32x1024xbf16, #tpu.memory_space<vmem>>, vector<32x1024xbf16>
    tpu.vector_store %arg10[%c0_28, %c0_29], %44 {strides = array<i32>} : memref<32x1024xbf16, #tpu.memory_space<vmem>>, vector<32x1024xbf16>,
    return
  }
  func.func @transform_0(%arg0: i32) -> (i32, i32) {
    %c0_i32 = arith.constant 0 : i32
    %c0_i32_0 = arith.constant 0 : i32
    return %arg0, %c0_i32 : i32, i32
  }
  func.func @transform_1(%arg0: i32) -> (i32, i32) {
    %c0_i32 = arith.constant 0 : i32
    %c0_i32_0 = arith.constant 0 : i32
    %c0_i32_1 = arith.constant 0 : i32
    return %c0_i32, %c0_i32_0 : i32, i32
  }
  func.func @transform_2(%arg0: i32) -> (i32, i32) {
    %c0_i32 = arith.constant 0 : i32
    %c0_i32_0 = arith.constant 0 : i32
    %c0_i32_1 = arith.constant 0 : i32
    return %c0_i32, %c0_i32_0 : i32, i32
  }
  func.func @transform_3(%arg0: i32) -> (i32, i32) {
    %c0_i32 = arith.constant 0 : i32
    %c0_i32_0 = arith.constant 0 : i32
    %c0_i32_1 = arith.constant 0 : i32
    return %c0_i32, %c0_i32_0 : i32, i32
  }
  func.func @transform_4(%arg0: i32) -> (i32, i32) {
    %c0_i32 = arith.constant 0 : i32
    %c0_i32_0 = arith.constant 0 : i32
    %c0_i32_1 = arith.constant 0 : i32
    return %c0_i32, %c0_i32_0 : i32, i32
  }
  func.func @transform_5(%arg0: i32) -> (i32, i32) {
    %c0_i32 = arith.constant 0 : i32
    %c0_i32_0 = arith.constant 0 : i32
    %c0_i32_1 = arith.constant 0 : i32
    return %c0_i32, %c0_i32_0 : i32, i32
  }
  func.func @transform_6(%arg0: i32) -> (i32, i32) {
    %c0_i32 = arith.constant 0 : i32
    %c0_i32_0 = arith.constant 0 : i32
    %c0_i32_1 = arith.constant 0 : i32
    return %c0_i32, %c0_i32_0 : i32, i32
  }
  func.func @transform_7(%arg0: i32) -> (i32, i32) {
    %c0_i32 = arith.constant 0 : i32
    %c0_i32_0 = arith.constant 0 : i32
    %c0_i32_1 = arith.constant 0 : i32
    return %c0_i32, %c0_i32_0 : i32, i32
  }
  func.func @transform_8(%arg0: i32) -> (i32, i32) {
    %c0_i32 = arith.constant 0 : i32
    %c0_i32_0 = arith.constant 0 : i32
    %c0_i32_1 = arith.constant 0 : i32
    return %c0_i32, %c0_i32_0 : i32, i32
  }
  func.func @transform_9(%arg0: i32) -> (i32, i32) {
    %c0_i32 = arith.constant 0 : i32
    %c0_i32_0 = arith.constant 0 : i32
    return %arg0, %c0_i32 : i32, i32
  }
}

</mosaic_0001>

<bundles_post_ra>
// kernel: decoder_forward.1
= control target key start
LH: loop header
LB: loop body
LE: loop exit
PB: predicated region body
PF: predicated region fallthrough
CT: control target
= control target key end

     0   :  { %14 = vsyncpa [#allocation3], 0  ;;  %s2435_s0 = inlined_call_operand.vmem [shape: bf16[128,64], index: 0, kind: input, shape index: {}]   ;;  %s2436_s1 = inlined_call_operand.hbm [shape: bf16[64,128], index: 1, kind: input, shape index: {}]   ;;  %s2437_s2 = inlined_call_operand.hbm [shape: bf16[128,256], index: 2, kind: input, shape index: {}]   ;;  %s2438_s3 = inlined_call_operand.hbm [shape: bf16[128,256], index: 3, kind: input, shape index: {}]   ;;  %s2439_s4 = inlined_call_operand.hbm [shape: bf16[128,256], index: 4, kind: input, shape index: {}]   ;;  %s2440_s5 = inlined_call_operand.hbm [shape: f32[1,128], index: 5, kind: input, shape index: {}]   ;;  %s2441_s6 = inlined_call_operand.hbm [shape: f32[1,256], index: 6, kind: input, shape index: {}]   ;;  %s2442_s7 = inlined_call_operand.hbm [shape: f32[1,512], index: 7, kind: input, shape index: {}]   ;;  %s2443_s8 = inlined_call_operand.hbm [shape: f32[1,1024], index: 8, kind: input, shape index: {}]   ;;  %s2444_s9 = inlined_call_operand.vmem [shape: bf16[128,1024], index: 9, kind: output, shape index: {}]  }
   0x1   :  { %15 = vsyncpa [#allocation5], 0 }
   0x2   :  { %16 = vsyncpa [#allocation8], 0 }
   0x3   :  { %17 = vsyncpa [#allocation11], 0 }
   0x4   :  { %18 = vsyncpa [#allocation14], 0  ;;  %s2212_s30 = smov 0  }
   0x5 LB: > { %s274_s12 = sshll.u32 %s2437_s2, 4  ;;  %s2445_s13 = sadd.s32 4294967295, %s2148_s30   ;;  %s2148_s30 = sphi %s2212_s30, %s24_s30   ;;  %s275_s12 = int_to_ptr.hbm [resolvable:$true] %s274_s12 }
   0x6   : > { %p1481_p0 = scmp.ge.s32.totalorder %s2148_s30, 1  ;;  %p249_p1 = scmp.lt.s32.totalorder %s2148_s30, 5 }
   0x7   : > { %p2225_p2 = scmp.eq.s32.totalorder %s2445_s13, 0  ;;  %s2150_s16 = smov [#allocation4]  }
   0x8   : > { %p2229_p3 = pnand %p1481_p0, %p249_p1  ;;  %s276_s17 = sshll.u32 %s2150_s16, 4  ;;  %s277_s17 = int_to_ptr.vmem [resolvable:$true] %s276_s17 }
   0x9   : > { %s302_s20 = sshll.u32 %s2439_s4, 4  ;;  %s2151_s22 = smov [#allocation7]   ;;  %s303_s20 = int_to_ptr.hbm [resolvable:$true] %s302_s20 }
   0xa   : > { %p1820_p4 = pneg %p2229_p3  ;;  %s304_s23 = sshll.u32 %s2151_s22, 4  ;;  %s305_s23 = int_to_ptr.vmem [resolvable:$true] %s304_s23 }
   0xb   : > { %s329_s26 = sshll.u32 %s2441_s6, 4  ;;  %s2152_s27 = smov 128   ;;  %s330_s26 = int_to_ptr.hbm [resolvable:$true] %s329_s26 }
   0xc   : > { %p2240_p5 = pnand %p2225_p2, %p1820_p4  ;;  %s2153_s28 = smov 8  }
   0xd   : > { %s2154_s29 = smov [#allocation10]   ;;  %s260_s18 = sshll.u32 %s2436_s1, 4  ;;  %s261_s18 = int_to_ptr.hbm [resolvable:$true] %s260_s18 }
   0xe   : > { %1826 = dma.hbm_to_vmem [thread:$0]  (!%p2240_p5), %s275_s12, 2048, %s277_s17, [#allocation5], %s2152_s27, %s2152_s27, %s2153_s28  }
   0xf   : > { %1832 = dma.hbm_to_vmem [thread:$0]  (!%p2240_p5), %s303_s20, 2048, %s305_s23, [#allocation8], %s2152_s27, %s2152_s27, %s2153_s28  }
  0x10   : > { %s331_s10 = sshll.u32 %s2154_s29, 4  ;;  %s2155_s19 = smov [#allocation2]   ;;  %s332_s10 = int_to_ptr.vmem [resolvable:$true] %s331_s10 }
  0x11   : > { %1838 = dma.hbm_to_vmem [thread:$0]  (!%p2240_p5), %s330_s26, 32, %s332_s10, [#allocation11]  }
  0x12   : > { %s262_s22 = sshll.u32 %s2155_s19, 4  ;;  %s288_s12 = sshll.u32 %s2438_s3, 4  ;;  %s263_s22 = int_to_ptr.vmem [resolvable:$true] %s262_s22  ;;  %s289_s12 = int_to_ptr.hbm [resolvable:$true] %s288_s12 }
  0x13   : > { %s2156_s17 = smov 64   ;;  %s2157_s20 = smov 4  }
  0x14   : > { %1823 = dma.hbm_to_vmem [thread:$0]  (!%p2240_p5), %s261_s18, 512, %s263_s22, [#allocation3], %s2156_s17, %s2156_s17, %s2157_s20  }
  0x15   : > { %s2158_s23 = smov [#allocation6]   ;;  %s317_s26 = sshll.u32 %s2440_s5, 4  ;;  %s318_s26 = int_to_ptr.hbm [resolvable:$true] %s317_s26 }
  0x16   : > { %s290_s29 = sshll.u32 %s2158_s23, 4  ;;  %s341_s24 = sshll.u32 %s2442_s7, 4  ;;  %s291_s29 = int_to_ptr.vmem [resolvable:$true] %s290_s29  ;;  %s342_s24 = int_to_ptr.hbm [resolvable:$true] %s341_s24 }
  0x17   : > { %1829 = dma.hbm_to_vmem [thread:$0]  (!%p2240_p5), %s289_s12, 2048, %s291_s29, [#allocation5], %s2152_s27, %s2152_s27, %s2153_s28  }
  0x18   : > { %s2159_s25 = smov [#allocation9]   ;;  %s2160_s18 = smov [#allocation12]  }
  0x19   : > { %s319_s13 = sshll.u32 %s2159_s25, 4  ;;  %s343_s22 = sshll.u32 %s2160_s18, 4  ;;  %s320_s13 = int_to_ptr.vmem [resolvable:$true] %s319_s13  ;;  %s344_s22 = int_to_ptr.vmem [resolvable:$true] %s343_s22 }
  0x1a   : > { %1835 = dma.hbm_to_vmem [thread:$0]  (!%p2240_p5), %s318_s26, 16, %s320_s13, [#allocation8]  }
  0x1b   : > { %s353_s23 = sshll.u32 %s2443_s8, 4  ;;  %s2161_s27 = smov [#allocation13]   ;;  %s354_s23 = int_to_ptr.hbm [resolvable:$true] %s353_s23 }
  0x1c   : > { %1841 = dma.hbm_to_vmem [thread:$0]  (!%p2240_p5), %s342_s24, 64, %s344_s22, [#allocation11]  }
  0x1d   : > { %s355_s28 = sshll.u32 %s2161_s27, 4  ;;  %377 = sbr.rel (%p2229_p3) target bundleno = 710 (0x2c6), region = 56  ;;  %s356_s28 = int_to_ptr.vmem [resolvable:$true] %s355_s28 }
  0x1e   : > { %1844 = dma.hbm_to_vmem [thread:$0]  (!%p2240_p5), %s354_s23, 128, %s356_s28, [#allocation14]  }
  0x22   : > { %2127 = dma.done.wait (%p2225_p2), [#allocation3], 512  }
  0x23   : > { %2129 = vsyncadd (%p2225_p2), [#allocation3], 4294966784 }
  0x24   : > { %2131 = dma.done.wait (%p2225_p2), [#allocation5], 4096  }
  0x25   : > { %2133 = vsyncadd (%p2225_p2), [#allocation5], 4294963200 }
  0x26   : > { %2135 = dma.done.wait (%p2225_p2), [#allocation8], 2064  }
  0x27   : > { %2137 = vsyncadd (%p2225_p2), [#allocation8], 4294965232 }
  0x28   : > { %2139 = dma.done.wait (%p2225_p2), [#allocation11], 96  }
  0x29   : > { %2141 = vsyncadd (%p2225_p2), [#allocation11], 4294967200 }
  0x2a   : > { %2143 = dma.done.wait (%p2225_p2), [#allocation14], 128  }
  0x2b   : > { %2145 = vsyncadd (%p2225_p2), [#allocation14], 4294967168  ;;  %s2449_s13 = sadd.s32 4294967295, %s2148_s30   ;;  %v1731_v0 = vld [vmem:[#allocation2 + $0x18] sm:$0xff]  ;;  %v1730_v1 = vld [vmem:[#allocation2 + $0x10] sm:$0xff]  ;;  %vm514_vm0 = vcmask 523264  }
  0x2c   : > { %s1500_s15 = sshll.u32 %s2449_s13, 2  ;;  %525 = vmatpush.bf16.msra.mxu0 %v1731_v0  ;;  %v1589_v2 = vld [vmem:[#allocation4 + $0x70] sm:$0xf]  ;;  %v1747_v3 = vld [vmem:[#allocation4 + $0x74] sm:$0xf0]  ;;  %v1729_v13 = vld [vmem:[#allocation2 + $0x8] sm:$0xff] }
  0x2d   : > { %p451_p6 = scmp.lt.s32.totalorder %s1500_s15, 15  ;;  %v1746_v4 = vld [vmem:[#allocation4 + $0x74] sm:$0xf]  ;;  %v1590_v5 = vor.u32 %v1747_v3, %v1589_v2  ;;  %v1591_v6 = vld [vmem:[#allocation4 + $0x78] sm:$0xf0]  ;;  %v1728_v20 = vld [vmem:[#allocation2] sm:$0xff] }
  0x2e   : > { %v1581_v7 = vld [vmem:[#allocation4 + $0x60] sm:$0xf]  ;;  %v1745_v8 = vld [vmem:[#allocation4 + $0x64] sm:$0xf0]  ;;  %v1594_v9 = vor.u32 %v1746_v4, %v1591_v6  ;;  %v1744_v10 = vld [vmem:[#allocation4 + $0x64] sm:$0xf] }
  0x2f   : > { %s2451_s15 = smov (!%p451_p6, %s1500_s15), 15  ;;  %v1583_v11 = vld [vmem:[#allocation4 + $0x68] sm:$0xf0]  ;;  %648 = vmatpush.bf16.msra.mxu1 %v1590_v5  ;;  %v1582_v12 = vor.u32 %v1745_v8, %v1581_v7  ;;  %v1573_v15 = vld [vmem:[#allocation4 + $0x50] sm:$0xf] }
  0x30   : > { %526 = vmatpush.bf16.msra.mxu0 %v1730_v1  ;;  %s1501_s14 = sshll.u32 %s2451_s15, 2  ;;  %667 = vmatpush.bf16.msra.mxu2 %v1594_v9  ;;  %v1586_v14 = vor.u32 %v1744_v10, %v1583_v11  ;;  %v1743_v16 = vld [vmem:[#allocation4 + $0x54] sm:$0xf0]  ;;  %v1742_v17 = vld [vmem:[#allocation4 + $0x54] sm:$0xf]  ;;  %s1725_s11 = sshll.u32 %s2451_s15, 5 }
  0x31   : > { %v1575_v18 = vld [vmem:[#allocation4 + $0x58] sm:$0xf0]  ;;  %v1574_v19 = vor.u32 %v1743_v16, %v1573_v15  ;;  %s454_s29 = scalar_lea.vmem %s2435_s0, %s1501_s14  ;;  %v1565_v22 = vld [vmem:[#allocation4 + $0x40] sm:$0xf]  ;;  %v1741_v23 = vld [vmem:[#allocation4 + $0x44] sm:$0xf0]  ;;  %s2404_s10 = scalar_lea.vmem %s2444_s9, %s1725_s11 }
  0x32   : > { %v1578_v21 = vor.u32 %v1742_v17, %v1575_v18  ;;  %v1740_v24 = vld [vmem:[#allocation4 + $0x44] sm:$0xf]  ;;  %v1567_v25 = vld [vmem:[#allocation4 + $0x48] sm:$0xf0]  ;;  %v1566_v27 = vor.u32 %v1741_v23, %v1565_v22  ;;  %v1557_v30 = vld [vmem:[#allocation4 + $0x30] sm:$0xf] }
  0x33   : > { %649 = vmatpush.bf16.msra.mxu1 %v1582_v12  ;;  %v1726_v26 = vld [vmem:[%s454_s29] sm:$0xff]  ;;  %v1570_v28 = vor.u32 %v1740_v24, %v1567_v25  ;;  %v1727_v29 = vld [vmem:[%s454_s29 + $0x8] sm:$0xff]  ;;  %v1739_v31 = vld [vmem:[#allocation4 + $0x34] sm:$0xf0] }
  0x34   : > { %527 = vmatpush.bf16.msra.mxu0 %v1729_v13  ;;  %668 = vmatpush.bf16.msra.mxu2 %v1586_v14  ;;  %v1738_v32 = vld [vmem:[#allocation4 + $0x34] sm:$0xf]  ;;  %v1558_v33 = vor.u32 %v1739_v31, %v1557_v30  ;;  %v1559_v34 = vld [vmem:[#allocation4 + $0x38] sm:$0xf0]  ;;  %v1549_v36 = vld [vmem:[#allocation4 + $0x20] sm:$0xf] }
  0x35   : > { %v1562_v35 = vor.u32 %v1738_v32, %v1559_v34  ;;  %v1737_v37 = vld [vmem:[#allocation4 + $0x24] sm:$0xf0]  ;;  %v1736_v38 = vld [vmem:[#allocation4 + $0x24] sm:$0xf]  ;;  %v1551_v40 = vld [vmem:[#allocation4 + $0x28] sm:$0xf0] }
  0x36   : > { %v1550_v39 = vor.u32 %v1737_v37, %v1549_v36  ;;  %v1554_v41 = vor.u32 %v1736_v38, %v1551_v40  ;;  %v1541_v42 = vld [vmem:[#allocation4 + $0x10] sm:$0xf]  ;;  %v1735_v43 = vld [vmem:[#allocation4 + $0x14] sm:$0xf0]  ;;  %v1734_v44 = vld [vmem:[#allocation4 + $0x14] sm:$0xf] }
  0x37   : > { %650 = vmatpush.bf16.msra.mxu1 %v1574_v19  ;;  %v1542_v45 = vor.u32 %v1735_v43, %v1541_v42  ;;  %v1543_v46 = vld [vmem:[#allocation4 + $0x18] sm:$0xf0]  ;;  %v1533_v48 = vld [vmem:[#allocation4] sm:$0xf]  ;;  %v1733_v49 = vld [vmem:[#allocation4 + $0x4] sm:$0xf0] }
  0x38   : > { %528 = vmatpush.bf16.msra.mxu0 %v1728_v20  ;;  %669 = vmatpush.bf16.msra.mxu2 %v1578_v21  ;;  %v1546_v47 = vor.u32 %v1734_v44, %v1543_v46  ;;  %v1732_v50 = vld [vmem:[#allocation4 + $0x4] sm:$0xf]  ;;  %v1534_v51 = vor.u32 %v1733_v49, %v1533_v48  ;;  %v1535_v52 = vld [vmem:[#allocation4 + $0x8] sm:$0xf0]  ;;  %v1653_v54 = vld [vmem:[#allocation6 + $0x70] sm:$0xf] }
  0x39   : > { %v1538_v53 = vor.u32 %v1732_v50, %v1535_v52  ;;  %v1763_v55 = vld [vmem:[#allocation6 + $0x74] sm:$0xf0]  ;;  %v1762_v56 = vld [vmem:[#allocation6 + $0x74] sm:$0xf]  ;;  %v1655_v59 = vld [vmem:[#allocation6 + $0x78] sm:$0xf0] }
  0x3a   : > { %v1654_v58 = vor.u32 %v1763_v55, %v1653_v54  ;;  %v1645_v60 = vld [vmem:[#allocation6 + $0x60] sm:$0xf]  ;;  %v1761_v61 = vld [vmem:[#allocation6 + $0x64] sm:$0xf0]  ;;  %v1658_v62 = vor.u32 %v1762_v56, %v1655_v59  ;;  %v1760_v63 = vld [vmem:[#allocation6 + $0x64] sm:$0xf] }
  0x3b   : > { %1529 = vmatmul.msk.bf16.vlgmr.msra.gmra.mxu0 %vm514_vm0, %v1726_v26  ;;  %651 = vmatpush.bf16.msra.mxu1 %v1566_v27  ;;  %v1647_v0 = vld [vmem:[#allocation6 + $0x68] sm:$0xf0]  ;;  %v1646_v1 = vor.u32 %v1761_v61, %v1645_v60  ;;  %v1881_v2 = vld [vmem:[#allocation9] ss:$0 sm:$0xff]  ;;  %v1637_v17 = vld [vmem:[#allocation6 + $0x50] sm:$0xf] }
  0x3c   : > { %670 = vmatpush.bf16.msra.mxu2 %v1570_v28  ;;  %806 = vmatpush.bf16.msra.mxu3 %v1654_v58  ;;  %v1650_v3 = vor.u32 %v1760_v63, %v1647_v0  ;;  %v1759_v18 = vld [vmem:[#allocation6 + $0x54] sm:$0xf0]  ;;  %v1758_v19 = vld [vmem:[#allocation6 + $0x54] sm:$0xf]  ;;  %v1639_v21 = vld [vmem:[#allocation6 + $0x58] sm:$0xf0] }
  0x3d   : > { %825 = vmatpush.bf16.msrb.mxu0 %v1658_v62  ;;  %v1638_v20 = vor.u32 %v1759_v18, %v1637_v17  ;;  %v1642_v22 = vor.u32 %v1758_v19, %v1639_v21  ;;  %v1629_v23 = vld [vmem:[#allocation6 + $0x40] sm:$0xf]  ;;  %v1757_v24 = vld [vmem:[#allocation6 + $0x44] sm:$0xf0]  ;;  %v1756_v26 = vld [vmem:[#allocation6 + $0x44] sm:$0xf] }
  0x3e   : > { %v1630_v25 = vor.u32 %v1757_v24, %v1629_v23  ;;  %v1631_v27 = vld [vmem:[#allocation6 + $0x48] sm:$0xf0]  ;;  %v1755_v30 = vld [vmem:[#allocation6 + $0x34] sm:$0xf0]  ;;  %v1754_v31 = vld [vmem:[#allocation6 + $0x34] sm:$0xf] }
  0x3f   : > { %652 = vmatpush.bf16.msra.mxu1 %v1558_v33  ;;  %v1634_v28 = vor.u32 %v1756_v26, %v1631_v27  ;;  %v1623_v33 = vld [vmem:[#allocation6 + $0x38] sm:$0xf0]  ;;  %v1753_v36 = vld [vmem:[#allocation6 + $0x24] sm:$0xf0]  ;;  %v1752_v37 = vld [vmem:[#allocation6 + $0x24] sm:$0xf] }
  0x40   : > { %671 = vmatpush.bf16.msra.mxu2 %v1562_v35  ;;  %807 = vmatpush.bf16.msra.mxu3 %v1646_v1  ;;  %v1626_v34 = vor.u32 %v1754_v31, %v1623_v33  ;;  %v1613_v35 = vld [vmem:[#allocation6 + $0x20] sm:$0xf]  ;;  %v1751_v42 = vld [vmem:[#allocation6 + $0x14] sm:$0xf0]  ;;  %v1750_v43 = vld [vmem:[#allocation6 + $0x14] sm:$0xf] }
  0x41   : > { %826 = vmatpush.bf16.msrb.mxu0 %v1650_v3  ;;  %v1614_v38 = vor.u32 %v1753_v36, %v1613_v35  ;;  %v1749_v48 = vld [vmem:[#allocation6 + $0x4] sm:$0xf0]  ;;  %v1748_v49 = vld [vmem:[#allocation6 + $0x4] sm:$0xf]  ;;  %v562_v54 = vld [vmem:[#allocation10] sm:$0x3] }
  0x42   : > { %v565_v55 = vperm.slane %v562_v54, 1  ;;  %v1717_v60 = vld [vmem:[#allocation7 + $0x70] sm:$0xf]  ;;  %v1779_v61 = vld [vmem:[#allocation7 + $0x74] sm:$0xf0] }
  0x43   : > { %653 = vmatpush.bf16.msra.mxu1 %v1550_v39  ;;  %v1615_v39 = vld [vmem:[#allocation6 + $0x28] sm:$0xf0]  ;;  %v2308_v0 = vor.u32 %v1779_v61, %v1717_v60  ;;  %v1687_v60 = vld [vmem:[#allocation7 + $0x38] sm:$0xf0] }
  0x44   : > { %672 = vmatpush.bf16.msra.mxu2 %v1554_v41  ;;  %808 = vmatpush.bf16.msra.mxu3 %v1638_v20  ;;  %v1618_v40 = vor.u32 %v1752_v37, %v1615_v39  ;;  %v1605_v41 = vld [vmem:[#allocation6 + $0x10] sm:$0xf] }
  0x45   : > { %827 = vmatpush.bf16.msrb.mxu0 %v1642_v22  ;;  %v1606_v44 = vor.u32 %v1751_v42, %v1605_v41 }
  0x47   : > { %654 = vmatpush.bf16.msra.mxu1 %v1542_v45  ;;  %v1607_v45 = vld [vmem:[#allocation6 + $0x18] sm:$0xf0] }
  0x48   : > { %673 = vmatpush.bf16.msra.mxu2 %v1546_v47  ;;  %809 = vmatpush.bf16.msra.mxu3 %v1630_v25  ;;  %v1610_v46 = vor.u32 %v1750_v43, %v1607_v45  ;;  %v1597_v47 = vld [vmem:[#allocation6] sm:$0xf]  ;;  %v1775_v45 = vld [vmem:[#allocation7 + $0x54] sm:$0xf0] }
  0x49   : > { %828 = vmatpush.bf16.msrb.mxu0 %v1634_v28  ;;  %v1598_v50 = vor.u32 %v1749_v48, %v1597_v47  ;;  %v1774_v47 = vld [vmem:[#allocation7 + $0x54] sm:$0xf]  ;;  %v1703_v48 = vld [vmem:[#allocation7 + $0x58] sm:$0xf0] }
  0x4b   : > { %1530 = vmatmul.msk.bf16.gmra.mxu0 %vm514_vm0, %v1727_v29  ;;  %655 = vmatpush.bf16.msra.mxu1 %v1534_v51  ;;  %v1621_v29 = vld [vmem:[#allocation6 + $0x30] sm:$0xf]  ;;  %v1599_v51 = vld [vmem:[#allocation6 + $0x8] sm:$0xf0] }
  0x4c   : > { %674 = vmatpush.bf16.msra.mxu2 %v1538_v53  ;;  %v1622_v32 = vor.u32 %v1755_v30, %v1621_v29  ;;  %v1602_v52 = vor.u32 %v1748_v49, %v1599_v51  ;;  %v2326_v49 = vor.u32 %v1774_v47, %v1703_v48  ;;  %v1773_v51 = vld [vmem:[#allocation7 + $0x44] sm:$0xf0] }
  0x4d   : > { %829 = vmatpush.bf16.msrb.mxu0 %v1626_v34 }
  0x4e   : > { %810 = vmatpush.bf16.msra.mxu3 %v1622_v32 }
  0x4f   : > { %852 = vmatpush.bf16.msrb.mxu1 %v1654_v58 }
  0x50   : > { %871 = vmatpush.bf16.msrb.mxu2 %v1658_v62  ;;  %v1778_v62 = vld [vmem:[#allocation7 + $0x74] sm:$0xf] }
  0x51   : > { %830 = vmatpush.bf16.msrb.mxu0 %v1618_v40 }
  0x52   : > { %811 = vmatpush.bf16.msra.mxu3 %v1614_v38 }
  0x53   : > { %853 = vmatpush.bf16.msrb.mxu1 %v1646_v1  ;;  %v1719_v1 = vld [vmem:[#allocation7 + $0x78] sm:$0xf0] }
  0x54   : > { %872 = vmatpush.bf16.msrb.mxu2 %v1650_v3  ;;  %v2310_v3 = vor.u32 %v1778_v62, %v1719_v1  ;;  %v1677_v62 = vld [vmem:[#allocation7 + $0x20] sm:$0xf]  ;;  %v1768_v1 = vld [vmem:[#allocation7 + $0x24] sm:$0xf] }
  0x55   : > { %831 = vmatpush.bf16.msrb.mxu0 %v1610_v46 }
  0x56   : > { %812 = vmatpush.bf16.msra.mxu3 %v1606_v44 }
  0x57   : > { %854 = vmatpush.bf16.msrb.mxu1 %v1638_v20 }
  0x58   : > { %873 = vmatpush.bf16.msrb.mxu2 %v1642_v22 }
  0x59   : > { %832 = vmatpush.bf16.msrb.mxu0 %v1602_v52 }
  0x5a   : > { %813 = vmatpush.bf16.msra.mxu3 %v1598_v50 }
  0x5b   : > { %855 = vmatpush.bf16.msrb.mxu1 %v1630_v25 }
  0x5c   : > { %874 = vmatpush.bf16.msrb.mxu2 %v1634_v28 }
  0x5d   : > { %1067 = vmatpush.bf16.msra.mxu0 %v2310_v3 }
  0x5e   : > { %1048 = vmatpush.bf16.msrb.mxu3 %v2308_v0 }
  0x5f   : > { %856 = vmatpush.bf16.msrb.mxu1 %v1622_v32 }
  0x60   : > { %875 = vmatpush.bf16.msrb.mxu2 %v1626_v34 }
  0x63   : > { %857 = vmatpush.bf16.msrb.mxu1 %v1614_v38 }
  0x64   : > { %876 = vmatpush.bf16.msrb.mxu2 %v1618_v40 }
  0x67   : > { %858 = vmatpush.bf16.msrb.mxu1 %v1606_v44  ;;  %v1701_v44 = vld [vmem:[#allocation7 + $0x50] sm:$0xf] }
  0x68   : > { %877 = vmatpush.bf16.msrb.mxu2 %v1610_v46  ;;  %v2324_v46 = vor.u32 %v1775_v45, %v1701_v44 }
  0x6b   : > { %859 = vmatpush.bf16.msrb.mxu1 %v1598_v50  ;;  %v1693_v50 = vld [vmem:[#allocation7 + $0x40] sm:$0xf] }
  0x6c   : > { %878 = vmatpush.bf16.msrb.mxu2 %v1602_v52  ;;  %v1772_v52 = vld [vmem:[#allocation7 + $0x44] sm:$0xf] }
  0xb8   : > { %v530_v57 = vpop.f32.mrf.mxu0 }
  0xb9   : > { %v531_v4 = vadd.f32 %v1881_v2, %v530_v57  ;;  %v564_v57 = vperm.slane %v562_v54, 0  ;;  %v1695_v54 = vld [vmem:[#allocation7 + $0x48] sm:$0xf0] }
  0xbb   : > { %v540_v7 = vmax.f32 %v531_v4, 0.0  ;;  %v1777_v4 = vld [vmem:[#allocation7 + $0x64] sm:$0xf0] }
  0xc0   : > { %v532_v5 = vpop.f32.mrf.mxu0 }
  0xc1   : > { %v533_v6 = vadd.f32 %v1881_v2, %v532_v5  ;;  %v1776_v5 = vld [vmem:[#allocation7 + $0x64] sm:$0xf] }
  0xc3   : > { %v541_v8 = vmax.f32 %v533_v6, 0.0  ;;  %v1711_v6 = vld [vmem:[#allocation7 + $0x68] sm:$0xf0] }
  0xc5   : > { %v544_v9 = vpack.c.bf16 %v541_v8, %v540_v7 }
  0xc7   : > { %656 = vmatmul.bf16.vlgmr.msra.gmra.mxu1 %v544_v9  ;;  %675 = vmatmul.bf16.vlgmr.msra.gmra.mxu2 %v544_v9 }
  0xc8   : > { %v535_v10 = vpop.f32.mrf.mxu0  ;;  %1094 = vmatpush.bf16.msra.mxu1 %v2308_v0  ;;  %1113 = vmatpush.bf16.msra.mxu2 %v2310_v3 }
  0xc9   : > { %v536_v11 = vadd.f32 %v1881_v2, %v535_v10 }
  0xcb   : > { %v542_v14 = vmax.f32 %v536_v11, 0.0  ;;  %v2318_v11 = vor.u32 %v1776_v5, %v1711_v6  ;;  %v1669_v6 = vld [vmem:[#allocation7 + $0x10] sm:$0xf] }
  0xcd   : > { %1068 = vmatpush.bf16.msra.mxu0 %v2318_v11  ;;  %1114 = vmatpush.bf16.msra.mxu2 %v2318_v11 }
  0xd0   : > { %v537_v12 = vpop.f32.mrf.mxu0 }
  0xd1   : > { %v538_v13 = vadd.f32 %v1881_v2, %v537_v12  ;;  %v1709_v2 = vld [vmem:[#allocation7 + $0x60] sm:$0xf]  ;;  %1069 = vmatpush.bf16.msra.mxu0 %v2326_v49  ;;  %1115 = vmatpush.bf16.msra.mxu2 %v2326_v49 }
  0xd2   : > { %v2314_v9 = vor.u32 %v1777_v4, %v1709_v2  ;;  %v1679_v4 = vld [vmem:[#allocation7 + $0x28] sm:$0xf0] }
  0xd3   : > { %v543_v15 = vmax.f32 %v538_v13, 0.0  ;;  %v1682_v5 = vor.u32 %v1768_v1, %v1679_v4 }
  0xd4   : > { %1049 = vmatpush.bf16.msrb.mxu3 %v2314_v9  ;;  %1095 = vmatpush.bf16.msra.mxu1 %v2314_v9 }
  0xd5   : > { %v545_v16 = vpack.c.bf16 %v543_v15, %v542_v14 }
  0xd7   : > { %661 = vmatmul.bf16.gmra.mxu1 %v545_v16  ;;  %680 = vmatmul.bf16.gmra.mxu2 %v545_v16 }
  0xd8   : > { %1050 = vmatpush.bf16.msrb.mxu3 %v2324_v46  ;;  %1096 = vmatpush.bf16.msra.mxu1 %v2324_v46 }
 0x144   : > { %v657_v53 = vpop.f32.mrf.mxu1 }
 0x145   : > { %v658_v63 = vadd.f32 %v657_v53, %v564_v57  ;;  %v2332_v53 = vor.u32 %v1773_v51, %v1693_v50 }
 0x147   : > { %v686_v12 = vmax.f32 %v658_v63, 0.0  ;;  %1051 = vmatpush.bf16.msrb.mxu3 %v2332_v53  ;;  %1097 = vmatpush.bf16.msra.mxu1 %v2332_v53  ;;  %v1769_v63 = vld [vmem:[#allocation7 + $0x24] sm:$0xf0] }
 0x148   : > { %v2344_v2 = vor.u32 %v1769_v63, %v1677_v62 }
 0x14a   : > { %v676_v56 = vpop.f32.mrf.mxu2 }
 0x14b   : > { %v677_v59 = vadd.f32 %v676_v56, %v565_v55  ;;  %v1685_v56 = vld [vmem:[#allocation7 + $0x30] sm:$0xf] }
 0x14c   : > { %v659_v58 = vpop.f32.mrf.mxu1 }
 0x14d   : > { %v687_v7 = vmax.f32 %v677_v59, 0.0  ;;  %v660_v8 = vadd.f32 %v659_v58, %v564_v57  ;;  %v1770_v58 = vld [vmem:[#allocation7 + $0x34] sm:$0xf] }
 0x14e   : > { %v1690_v61 = vor.u32 %v1770_v58, %v1687_v60 }
 0x14f   : > { %v694_v15 = vpack.c.bf16 %v687_v7, %v686_v12  ;;  %v688_v16 = vmax.f32 %v660_v8, 0.0  ;;  %v1767_v7 = vld [vmem:[#allocation7 + $0x14] sm:$0xf0]  ;;  %v1766_v8 = vld [vmem:[#allocation7 + $0x14] sm:$0xf] }
 0x150   : > { %v1671_v12 = vld [vmem:[#allocation7 + $0x18] sm:$0xf0] }
 0x151   : > { %v844_v19 = vunpack.c.h.b16 %v694_v15  ;;  %v718_v21 = vunpack.c.l.b16 %v694_v15  ;;  %v1765_v15 = vld [vmem:[#allocation7 + $0x4] sm:$0xf0] }
 0x152   : > { %v678_v10 = vpop.f32.mrf.mxu2 }
 0x153   : > { %v679_v13 = vadd.f32 %v678_v10, %v565_v55  ;;  %v2348_v10 = vor.u32 %v1767_v7, %v1669_v6 }
 0x154   : > { %v662_v14 = vpop.f32.mrf.mxu1 }
 0x155   : > { %v689_v17 = vmax.f32 %v679_v13, 0.0  ;;  %v663_v28 = vadd.f32 %v662_v14, %v564_v57  ;;  %v1674_v13 = vor.u32 %v1766_v8, %v1671_v12  ;;  %v1661_v14 = vld [vmem:[#allocation7] sm:$0xf] }
 0x157   : > { %v695_v18 = vpack.c.bf16 %v689_v17, %v688_v16  ;;  %v690_v32 = vmax.f32 %v663_v28, 0.0  ;;  %v1764_v16 = vld [vmem:[#allocation7 + $0x4] sm:$0xf]  ;;  %v2352_v17 = vor.u32 %v1765_v15, %v1661_v14 }
 0x159   : > { %v845_v20 = vunpack.c.h.b16 %v695_v18  ;;  %v719_v22 = vunpack.c.l.b16 %v695_v18  ;;  %v1663_v18 = vld [vmem:[#allocation7 + $0x8] sm:$0xf0] }
 0x15a   : > { %v681_v23 = vpop.f32.mrf.mxu2 }
 0x15b   : > { %v722_v24 = vpack.c.b16 %v719_v22, %v718_v21  ;;  %v848_v25 = vpack.c.b16 %v845_v20, %v844_v19  ;;  %v682_v26 = vadd.f32 %v681_v23, %v565_v55  ;;  %v1666_v19 = vor.u32 %v1764_v16, %v1663_v18  ;;  %v2368_v21 = vld [vmem:[#allocation12] sm:$0xf] }
 0x15c   : > { %v664_v27 = vpop.f32.mrf.mxu1  ;;  %v895_v62 = vperm.slane %v2368_v21, 3 }
 0x15d   : > { %814 = vmatmul.bf16.vlgmr.msra.gmra.mxu3 %v722_v24  ;;  %833 = vmatmul.bf16.vlgmr.msrb.gmra.mxu0 %v722_v24  ;;  %v691_v29 = vmax.f32 %v682_v26, 0.0  ;;  %v665_v30 = vadd.f32 %v664_v27, %v564_v57  ;;  %v1771_v57 = vld [vmem:[#allocation7 + $0x34] sm:$0xf0] }
 0x15e   : > { %860 = vmatmul.bf16.vlgmr.msrb.gmra.mxu1 %v848_v25  ;;  %879 = vmatmul.bf16.vlgmr.msrb.gmra.mxu2 %v848_v25  ;;  %v2340_v59 = vor.u32 %v1771_v57, %v1685_v56 }
 0x15f   : > { %v696_v34 = vpack.c.bf16 %v691_v29, %v690_v32  ;;  %v692_v35 = vmax.f32 %v665_v30, 0.0 }
 0x160   : > { %1052 = vmatpush.bf16.msrb.mxu3 %v2340_v59  ;;  %1098 = vmatpush.bf16.msra.mxu1 %v2340_v59 }
 0x161   : > { %v720_v38 = vunpack.c.l.b16 %v696_v34  ;;  %v846_v40 = vunpack.c.h.b16 %v696_v34 }
 0x162   : > { %v683_v31 = vpop.f32.mrf.mxu2 }
 0x163   : > { %v684_v33 = vadd.f32 %v683_v31, %v565_v55  ;;  %v2334_v55 = vor.u32 %v1772_v52, %v1695_v54 }
 0x164   : > { %1053 = vmatpush.bf16.msrb.mxu3 %v2344_v2  ;;  %1099 = vmatpush.bf16.msra.mxu1 %v2344_v2 }
 0x165   : > { %v693_v36 = vmax.f32 %v684_v33, 0.0  ;;  %1070 = vmatpush.bf16.msra.mxu0 %v2334_v55  ;;  %1116 = vmatpush.bf16.msra.mxu2 %v2334_v55 }
 0x167   : > { %v697_v37 = vpack.c.bf16 %v693_v36, %v692_v35 }
 0x168   : > { %1054 = vmatpush.bf16.msrb.mxu3 %v2348_v10  ;;  %1100 = vmatpush.bf16.msra.mxu1 %v2348_v10 }
 0x169   : > { %v721_v39 = vunpack.c.l.b16 %v697_v37  ;;  %v847_v41 = vunpack.c.h.b16 %v697_v37  ;;  %1071 = vmatpush.bf16.msra.mxu0 %v1690_v61  ;;  %1117 = vmatpush.bf16.msra.mxu2 %v1690_v61 }
 0x16b   : > { %v723_v42 = vpack.c.b16 %v721_v39, %v720_v38  ;;  %v849_v43 = vpack.c.b16 %v847_v41, %v846_v40 }
 0x16c   : > { %1055 = vmatpush.bf16.msrb.mxu3 %v2352_v17  ;;  %1101 = vmatpush.bf16.msra.mxu1 %v2352_v17 }
 0x16d   : > { %819 = vmatmul.bf16.gmra.mxu3 %v723_v42  ;;  %838 = vmatmul.bf16.gmra.mxu0 %v723_v42 }
 0x16e   : > { %865 = vmatmul.bf16.gmra.mxu1 %v849_v43  ;;  %884 = vmatmul.bf16.gmra.mxu2 %v849_v43 }
 0x16f   : > { %1072 = vmatpush.bf16.msra.mxu0 %v1682_v5  ;;  %1118 = vmatpush.bf16.msra.mxu2 %v1682_v5 }
 0x170   : > { %1144 = vmatpush.bf16.msra.mxu3 %v2308_v0  ;;  %1190 = vmatpush.bf16.msrb.mxu1 %v2308_v0 }
 0x173   : > { %1073 = vmatpush.bf16.msra.mxu0 %v1674_v13  ;;  %1119 = vmatpush.bf16.msra.mxu2 %v1674_v13 }
 0x174   : > { %1145 = vmatpush.bf16.msra.mxu3 %v2314_v9  ;;  %1191 = vmatpush.bf16.msrb.mxu1 %v2314_v9 }
 0x177   : > { %1074 = vmatpush.bf16.msra.mxu0 %v1666_v19  ;;  %1120 = vmatpush.bf16.msra.mxu2 %v1666_v19 }
 0x178   : > { %1146 = vmatpush.bf16.msra.mxu3 %v2324_v46  ;;  %1192 = vmatpush.bf16.msrb.mxu1 %v2324_v46 }
 0x17b   : > { %1163 = vmatpush.bf16.msrb.mxu0 %v2310_v3  ;;  %1209 = vmatpush.bf16.msrb.mxu2 %v2310_v3  ;;  %v892_v3 = vperm.slane %v2368_v21, 0 }
 0x17c   : > { %1147 = vmatpush.bf16.msra.mxu3 %v2332_v53  ;;  %1193 = vmatpush.bf16.msrb.mxu1 %v2332_v53 }
 0x17f   : > { %1164 = vmatpush.bf16.msrb.mxu0 %v2318_v11  ;;  %1210 = vmatpush.bf16.msrb.mxu2 %v2318_v11  ;;  %v893_v11 = vperm.slane %v2368_v21, 1 }
 0x180   : > { %1148 = vmatpush.bf16.msra.mxu3 %v2340_v59  ;;  %1194 = vmatpush.bf16.msrb.mxu1 %v2340_v59 }
 0x183   : > { %1165 = vmatpush.bf16.msrb.mxu0 %v2326_v49  ;;  %1211 = vmatpush.bf16.msrb.mxu2 %v2326_v49 }
 0x184   : > { %1149 = vmatpush.bf16.msra.mxu3 %v2344_v2  ;;  %1195 = vmatpush.bf16.msrb.mxu1 %v2344_v2 }
 0x187   : > { %1166 = vmatpush.bf16.msrb.mxu0 %v2334_v55  ;;  %1212 = vmatpush.bf16.msrb.mxu2 %v2334_v55 }
 0x188   : > { %1150 = vmatpush.bf16.msra.mxu3 %v2348_v10  ;;  %1196 = vmatpush.bf16.msrb.mxu1 %v2348_v10 }
 0x18b   : > { %1167 = vmatpush.bf16.msrb.mxu0 %v1690_v61  ;;  %1213 = vmatpush.bf16.msrb.mxu2 %v1690_v61 }
 0x18c   : > { %1151 = vmatpush.bf16.msra.mxu3 %v2352_v17  ;;  %1197 = vmatpush.bf16.msrb.mxu1 %v2352_v17 }
 0x18f   : > { %1168 = vmatpush.bf16.msrb.mxu0 %v1682_v5  ;;  %1214 = vmatpush.bf16.msrb.mxu2 %v1682_v5  ;;  %v894_v5 = vperm.slane %v2368_v21, 2 }
 0x193   : > { %1169 = vmatpush.bf16.msrb.mxu0 %v1674_v13  ;;  %1215 = vmatpush.bf16.msrb.mxu2 %v1674_v13 }
 0x197   : > { %1170 = vmatpush.bf16.msrb.mxu0 %v1666_v19  ;;  %1216 = vmatpush.bf16.msrb.mxu2 %v1666_v19 }
 0x1da   : > { %v834_v20 = vpop.f32.mrf.mxu0 }
 0x1db   : > { %v901_v25 = vadd.f32 %v893_v11, %v834_v20  ;;  %v861_v44 = vpop.f32.mrf.mxu1 }
 0x1dd   : > { %v917_v29 = vmax.f32 %v901_v25, 0.0 }
 0x1e0   : > { %v815_v22 = vpop.f32.mrf.mxu3 }
 0x1e1   : > { %v900_v24 = vadd.f32 %v892_v3, %v815_v22  ;;  %v880_v40 = vpop.f32.mrf.mxu2 }
 0x1e2   : > { %v836_v23 = vpop.f32.mrf.mxu0 }
 0x1e3   : > { %v916_v26 = vmax.f32 %v900_v24, 0.0  ;;  %v905_v27 = vadd.f32 %v893_v11, %v836_v23  ;;  %v863_v60 = vpop.f32.mrf.mxu1 }
 0x1e4   : > { %v906_v12 = vadd.f32 %v894_v5, %v863_v60 }
 0x1e5   : > { %v932_v32 = vpack.c.bf16 %v917_v29, %v916_v26  ;;  %v921_v33 = vmax.f32 %v905_v27, 0.0 }
 0x1e6   : > { %v922_v18 = vmax.f32 %v906_v12, 0.0 }
 0x1e7   : > { %v960_v36 = vunpack.c.l.b16 %v932_v32  ;;  %v1086_v37 = vunpack.c.h.b16 %v932_v32 }
 0x1e8   : > { %v817_v28 = vpop.f32.mrf.mxu3 }
 0x1e9   : > { %v904_v30 = vadd.f32 %v892_v3, %v817_v28  ;;  %v882_v55 = vpop.f32.mrf.mxu2 }
 0x1ea   : > { %v839_v31 = vpop.f32.mrf.mxu0  ;;  %v907_v6 = vadd.f32 %v895_v62, %v882_v55 }
 0x1eb   : > { %v920_v34 = vmax.f32 %v904_v30, 0.0  ;;  %v909_v48 = vadd.f32 %v893_v11, %v839_v31  ;;  %v866_v15 = vpop.f32.mrf.mxu1 }
 0x1ec   : > { %v923_v14 = vmax.f32 %v907_v6, 0.0 }
 0x1ed   : > { %v934_v35 = vpack.c.bf16 %v921_v33, %v920_v34  ;;  %v925_v52 = vmax.f32 %v909_v48, 0.0 }
 0x1ee   : > { %v935_v20 = vpack.c.bf16 %v923_v14, %v922_v18 }
 0x1ef   : > { %v961_v38 = vunpack.c.l.b16 %v934_v35  ;;  %v1087_v39 = vunpack.c.h.b16 %v934_v35 }
 0x1f0   : > { %v820_v41 = vpop.f32.mrf.mxu3 }
 0x1f1   : > { %v1090_v42 = vpack.c.b16 %v1087_v39, %v1086_v37  ;;  %v964_v43 = vpack.c.b16 %v961_v38, %v960_v36  ;;  %v908_v45 = vadd.f32 %v892_v3, %v820_v41  ;;  %v885_v13 = vpop.f32.mrf.mxu2  ;;  %v2394_v39 = vld [vmem:[#allocation13] sm:$0xff] }
 0x1f2   : > { %v841_v47 = vpop.f32.mrf.mxu0  ;;  %v911_v27 = vadd.f32 %v895_v62, %v885_v13  ;;  %v1231_v41 = vperm.slane %v2394_v39, 1 }
 0x1f3   : > { %1056 = vmatmul.bf16.vlgmr.msrb.gmra.mxu3 %v964_v43  ;;  %1075 = vmatmul.bf16.vlgmr.msra.gmra.mxu0 %v964_v43  ;;  %v924_v49 = vmax.f32 %v908_v45, 0.0  ;;  %v913_v50 = vadd.f32 %v893_v11, %v841_v47  ;;  %v868_v24 = vpop.f32.mrf.mxu1  ;;  %v1232_v43 = vperm.slane %v2394_v39, 2  ;;  %v1233_v45 = vperm.slane %v2394_v39, 3 }
 0x1f4   : > { %1102 = vmatmul.bf16.vlgmr.msra.gmra.mxu1 %v1090_v42  ;;  %1121 = vmatmul.bf16.vlgmr.msra.gmra.mxu2 %v1090_v42  ;;  %v914_v28 = vadd.f32 %v894_v5, %v868_v24  ;;  %v927_v30 = vmax.f32 %v911_v27, 0.0 }
 0x1f5   : > { %1780 = vmatpush.bf16.msrb.mxu3 %v2308_v0  ;;  %v936_v56 = vpack.c.bf16 %v925_v52, %v924_v49  ;;  %v929_v57 = vmax.f32 %v913_v50, 0.0 }
 0x1f7   : > { %v962_v63 = vunpack.c.l.b16 %v936_v56  ;;  %v1088_v0 = vunpack.c.h.b16 %v936_v56 }
 0x1f8   : > { %v822_v51 = vpop.f32.mrf.mxu3 }
 0x1f9   : > { %v912_v54 = vadd.f32 %v892_v3, %v822_v51  ;;  %1781 = vmatpush.bf16.msrb.mxu3 %v2314_v9  ;;  %v903_v9 = vadd.f32 %v895_v62, %v880_v40  ;;  %v1183_v3 = vunpack.c.h.b16 %v935_v20  ;;  %v887_v22 = vpop.f32.mrf.mxu2 }
 0x1fa   : > { %v915_v26 = vadd.f32 %v895_v62, %v887_v22 }
 0x1fb   : > { %v928_v58 = vmax.f32 %v912_v54, 0.0  ;;  %v919_v16 = vmax.f32 %v903_v9, 0.0 }
 0x1fc   : > { %v931_v29 = vmax.f32 %v915_v26, 0.0 }
 0x1fd   : > { %v938_v61 = vpack.c.bf16 %v929_v57, %v928_v58  ;;  %1782 = vmatpush.bf16.msrb.mxu3 %v2324_v46  ;;  %v902_v46 = vadd.f32 %v894_v5, %v861_v44  ;;  %v1230_v44 = vperm.slane %v2394_v39, 0 }
 0x1ff   : > { %v963_v1 = vunpack.c.l.b16 %v938_v61  ;;  %v1089_v4 = vunpack.c.h.b16 %v938_v61  ;;  %v918_v19 = vmax.f32 %v902_v46, 0.0 }
 0x201   : > { %v965_v7 = vpack.c.b16 %v963_v1, %v962_v63  ;;  %v1091_v8 = vpack.c.b16 %v1089_v4, %v1088_v0  ;;  %1783 = vmatpush.bf16.msrb.mxu3 %v2332_v53  ;;  %v933_v21 = vpack.c.bf16 %v919_v16, %v918_v19  ;;  %v1137_v53 = vunpack.c.l.b16 %v935_v20 }
 0x203   : > { %1061 = vmatmul.bf16.gmra.mxu3 %v965_v7  ;;  %1080 = vmatmul.bf16.gmra.mxu0 %v965_v7  ;;  %v1136_v11 = vunpack.c.l.b16 %v933_v21  ;;  %v1182_v23 = vunpack.c.h.b16 %v933_v21 }
 0x204   : > { %1107 = vmatmul.bf16.gmra.mxu1 %v1091_v8  ;;  %1126 = vmatmul.bf16.gmra.mxu2 %v1091_v8 }
 0x205   : > { %1784 = vmatpush.bf16.msrb.mxu3 %v2340_v59  ;;  %v1140_v25 = vpack.c.b16 %v1137_v53, %v1136_v11  ;;  %v1186_v59 = vpack.c.b16 %v1183_v3, %v1182_v23 }
 0x209   : > { %1785 = vmatpush.bf16.msrb.mxu3 %v2344_v2  ;;  %v910_v2 = vadd.f32 %v894_v5, %v866_v15 }
 0x20b   : > { %v926_v31 = vmax.f32 %v910_v2, 0.0 }
 0x20d   : > { %1786 = vmatpush.bf16.msrb.mxu3 %v2348_v10  ;;  %v930_v10 = vmax.f32 %v914_v28, 0.0  ;;  %v937_v33 = vpack.c.bf16 %v927_v30, %v926_v31 }
 0x20f   : > { %v939_v32 = vpack.c.bf16 %v931_v29, %v930_v10  ;;  %v1138_v36 = vunpack.c.l.b16 %v937_v33  ;;  %v1184_v37 = vunpack.c.h.b16 %v937_v33 }
 0x211   : > { %1787 = vmatpush.bf16.msrb.mxu3 %v2352_v17  ;;  %v1139_v34 = vunpack.c.l.b16 %v939_v32  ;;  %v1185_v35 = vunpack.c.h.b16 %v939_v32 }
 0x213   : > { %1152 = vmatmul.bf16.vlgmr.msra.gmra.mxu3 %v1140_v25  ;;  %1171 = vmatmul.bf16.vlgmr.msrb.gmra.mxu0 %v1140_v25  ;;  %v1141_v38 = vpack.c.b16 %v1139_v34, %v1138_v36  ;;  %v1187_v17 = vpack.c.b16 %v1185_v35, %v1184_v37  ;;  %v1235_v34 = vperm.slane %v2394_v39, 5 }
 0x214   : > { %1198 = vmatmul.bf16.vlgmr.msrb.gmra.mxu1 %v1186_v59  ;;  %1217 = vmatmul.bf16.vlgmr.msrb.gmra.mxu2 %v1186_v59 }
 0x223   : > { %1157 = vmatmul.bf16.gmra.mxu3 %v1141_v38  ;;  %1176 = vmatmul.bf16.gmra.mxu0 %v1141_v38  ;;  %v2414_v38 = vperm.slane %v2394_v39, 6 }
 0x224   : > { %1222 = vmatmul.bf16.gmra.mxu2 %v1187_v17 }
 0x233   : > { %1203 = vmatmul.bf16.vlgmr.msrb.gmra.mxu3 %v1187_v17 }
 0x270   : > { %v1076_v40 = vpop.f32.mrf.mxu0 }
 0x271   : > { %v1103_v42 = vpop.f32.mrf.mxu1  ;;  %v1247_v47 = vadd.f32 %v1231_v41, %v1076_v40  ;;  %v1234_v40 = vperm.slane %v2394_v39, 4 }
 0x272   : > { %v1248_v48 = vadd.f32 %v1232_v43, %v1103_v42  ;;  %v1237_v42 = vperm.slane %v2394_v39, 7 }
 0x273   : > { %v1279_v55 = vmax.f32 %v1247_v47, 0.0 }
 0x274   : > { %v1280_v58 = vmax.f32 %v1248_v48, 0.0 }
 0x276   : > { %v1057_v49 = vpop.f32.mrf.mxu3 }
 0x277   : > { %v1246_v50 = vadd.f32 %v1230_v44, %v1057_v49  ;;  %v1122_v51 = vpop.f32.mrf.mxu2 }
 0x278   : > { %v1249_v52 = vadd.f32 %v1233_v45, %v1122_v51  ;;  %v1078_v54 = vpop.f32.mrf.mxu0 }
 0x279   : > { %v1278_v56 = vmax.f32 %v1246_v50, 0.0  ;;  %v1105_v57 = vpop.f32.mrf.mxu1  ;;  %v1255_v63 = vadd.f32 %v1231_v41, %v1078_v54 }
 0x27a   : > { %v1281_v60 = vmax.f32 %v1249_v52, 0.0  ;;  %v1256_v1 = vadd.f32 %v1232_v43, %v1105_v57 }
 0x27b   : > { %v1310_v61 = vpack.c.bf16 %v1279_v55, %v1278_v56  ;;  %v1287_v8 = vmax.f32 %v1255_v63, 0.0 }
 0x27c   : > { %v1311_v62 = vpack.c.bf16 %v1281_v60, %v1280_v58  ;;  %v1288_v13 = vmax.f32 %v1256_v1, 0.0 }
 0x27d   : > { %1326 = vst [vmem:[%s2404_s10] sm:$0xff] %v1310_v61 }
 0x27e   : > { %1327 = vst [vmem:[%s2404_s10 + $0x8] sm:$0xff] %v1311_v62  ;;  %v1059_v0 = vpop.f32.mrf.mxu3 }
 0x27f   : > { %v1254_v4 = vadd.f32 %v1230_v44, %v1059_v0  ;;  %v1124_v5 = vpop.f32.mrf.mxu2 }
 0x280   : > { %v1257_v6 = vadd.f32 %v1233_v45, %v1124_v5  ;;  %v1081_v7 = vpop.f32.mrf.mxu0 }
 0x281   : > { %v1286_v9 = vmax.f32 %v1254_v4, 0.0  ;;  %v1108_v12 = vpop.f32.mrf.mxu1  ;;  %v1263_v16 = vadd.f32 %v1231_v41, %v1081_v7 }
 0x282   : > { %v1289_v46 = vmax.f32 %v1257_v6, 0.0  ;;  %v1264_v18 = vadd.f32 %v1232_v43, %v1108_v12 }
 0x283   : > { %v1314_v14 = vpack.c.bf16 %v1287_v8, %v1286_v9  ;;  %v1295_v22 = vmax.f32 %v1263_v16, 0.0 }
 0x284   : > { %v1315_v15 = vpack.c.bf16 %v1289_v46, %v1288_v13  ;;  %v1296_v24 = vmax.f32 %v1264_v18, 0.0 }
 0x285   : > { %1330 = vst [vmem:[%s2404_s10 + $0x20] sm:$0xff] %v1314_v14 }
 0x286   : > { %1331 = vst [vmem:[%s2404_s10 + $0x28] sm:$0xff] %v1315_v15  ;;  %v1062_v19 = vpop.f32.mrf.mxu3 }
 0x287   : > { %v1262_v20 = vadd.f32 %v1230_v44, %v1062_v19  ;;  %v1127_v21 = vpop.f32.mrf.mxu2 }
 0x288   : > { %v1265_v53 = vadd.f32 %v1233_v45, %v1127_v21  ;;  %v1083_v3 = vpop.f32.mrf.mxu0 }
 0x289   : > { %v1294_v11 = vmax.f32 %v1262_v20, 0.0  ;;  %v1110_v23 = vpop.f32.mrf.mxu1  ;;  %v1271_v27 = vadd.f32 %v1231_v41, %v1083_v3 }
 0x28a   : > { %v1297_v25 = vmax.f32 %v1265_v53, 0.0  ;;  %v1272_v28 = vadd.f32 %v1232_v43, %v1110_v23 }
 0x28b   : > { %v1318_v26 = vpack.c.bf16 %v1295_v22, %v1294_v11  ;;  %v1303_v32 = vmax.f32 %v1271_v27, 0.0 }
 0x28c   : > { %v1319_v59 = vpack.c.bf16 %v1297_v25, %v1296_v24  ;;  %v1304_v36 = vmax.f32 %v1272_v28, 0.0 }
 0x28d   : > { %1334 = vst [vmem:[%s2404_s10 + $0x40] sm:$0xff] %v1318_v26 }
 0x28e   : > { %1335 = vst [vmem:[%s2404_s10 + $0x48] sm:$0xff] %v1319_v59  ;;  %v1064_v2 = vpop.f32.mrf.mxu3 }
 0x28f   : > { %v1270_v29 = vadd.f32 %v1230_v44, %v1064_v2  ;;  %v1129_v30 = vpop.f32.mrf.mxu2 }
 0x290   : > { %v1273_v10 = vadd.f32 %v1233_v45, %v1129_v30  ;;  %v1172_v31 = vpop.f32.mrf.mxu0 }
 0x291   : > { %v1302_v33 = vmax.f32 %v1270_v29, 0.0  ;;  %v1199_v35 = vpop.f32.mrf.mxu1  ;;  %v1251_v43 = vadd.f32 %v1235_v34, %v1172_v31 }
 0x292   : > { %v1305_v37 = vmax.f32 %v1273_v10, 0.0  ;;  %v1252_v44 = vadd.f32 %v2414_v38, %v1199_v35 }
 0x293   : > { %v1322_v17 = vpack.c.bf16 %v1303_v32, %v1302_v33  ;;  %v1283_v51 = vmax.f32 %v1251_v43, 0.0 }
 0x294   : > { %v1323_v41 = vpack.c.bf16 %v1305_v37, %v1304_v36  ;;  %v1284_v54 = vmax.f32 %v1252_v44, 0.0 }
 0x295   : > { %1338 = vst [vmem:[%s2404_s10 + $0x60] sm:$0xff] %v1322_v17 }
 0x296   : > { %1339 = vst [vmem:[%s2404_s10 + $0x68] sm:$0xff] %v1323_v41  ;;  %v1153_v45 = vpop.f32.mrf.mxu3 }
 0x297   : > { %v1250_v47 = vadd.f32 %v1234_v40, %v1153_v45  ;;  %v1218_v48 = vpop.f32.mrf.mxu2 }
 0x298   : > { %v1253_v49 = vadd.f32 %v1237_v42, %v1218_v48  ;;  %v1174_v50 = vpop.f32.mrf.mxu0 }
 0x299   : > { %v1282_v52 = vmax.f32 %v1250_v47, 0.0  ;;  %v1201_v57 = vpop.f32.mrf.mxu1  ;;  %v1259_v39 = vadd.f32 %v1235_v34, %v1174_v50 }
 0x29a   : > { %v1285_v55 = vmax.f32 %v1253_v49, 0.0  ;;  %v1260_v60 = vadd.f32 %v2414_v38, %v1201_v57 }
 0x29b   : > { %v1312_v56 = vpack.c.bf16 %v1283_v51, %v1282_v52  ;;  %v1291_v4 = vmax.f32 %v1259_v39, 0.0 }
 0x29c   : > { %v1313_v58 = vpack.c.bf16 %v1285_v55, %v1284_v54  ;;  %v1292_v6 = vmax.f32 %v1260_v60, 0.0 }
 0x29d   : > { %1328 = vst [vmem:[%s2404_s10 + $0x10] sm:$0xff] %v1312_v56 }
 0x29e   : > { %1329 = vst [vmem:[%s2404_s10 + $0x18] sm:$0xff] %v1313_v58  ;;  %v1155_v61 = vpop.f32.mrf.mxu3 }
 0x29f   : > { %v1258_v62 = vadd.f32 %v1234_v40, %v1155_v61  ;;  %v1220_v63 = vpop.f32.mrf.mxu2 }
 0x2a0   : > { %v1261_v1 = vadd.f32 %v1237_v42, %v1220_v63  ;;  %v1177_v0 = vpop.f32.mrf.mxu0 }
 0x2a1   : > { %v1290_v5 = vmax.f32 %v1258_v62, 0.0  ;;  %v1267_v12 = vadd.f32 %v1235_v34, %v1177_v0 }
 0x2a2   : > { %v1293_v7 = vmax.f32 %v1261_v1, 0.0 }
 0x2a3   : > { %v1316_v8 = vpack.c.bf16 %v1291_v4, %v1290_v5  ;;  %v1299_v14 = vmax.f32 %v1267_v12, 0.0 }
 0x2a4   : > { %v1317_v9 = vpack.c.bf16 %v1293_v7, %v1292_v6 }
 0x2a5   : > { %1332 = vst [vmem:[%s2404_s10 + $0x30] sm:$0xff] %v1316_v8 }
 0x2a6   : > { %1333 = vst [vmem:[%s2404_s10 + $0x38] sm:$0xff] %v1317_v9  ;;  %v1158_v13 = vpop.f32.mrf.mxu3 }
 0x2a7   : > { %v1266_v46 = vadd.f32 %v1234_v40, %v1158_v13  ;;  %v1223_v53 = vpop.f32.mrf.mxu2 }
 0x2a8   : > { %v1179_v16 = vpop.f32.mrf.mxu0  ;;  %v1269_v23 = vadd.f32 %v1237_v42, %v1223_v53 }
 0x2a9   : > { %v1298_v15 = vmax.f32 %v1266_v46, 0.0  ;;  %v1275_v19 = vadd.f32 %v1235_v34, %v1179_v16 }
 0x2aa   : > { %v1301_v26 = vmax.f32 %v1269_v23, 0.0 }
 0x2ab   : > { %v1320_v18 = vpack.c.bf16 %v1299_v14, %v1298_v15  ;;  %v1307_v3 = vmax.f32 %v1275_v19, 0.0 }
 0x2ad   : > { %1336 = vst [vmem:[%s2404_s10 + $0x50] sm:$0xff] %v1320_v18 }
 0x2ae   : > { %v1160_v20 = vpop.f32.mrf.mxu3 }
 0x2af   : > { %v1274_v21 = vadd.f32 %v1234_v40, %v1160_v20  ;;  %v1225_v27 = vpop.f32.mrf.mxu2 }
 0x2b0   : > { %v1277_v2 = vadd.f32 %v1237_v42, %v1225_v27 }
 0x2b1   : > { %v1306_v22 = vmax.f32 %v1274_v21, 0.0 }
 0x2b2   : > { %v1309_v10 = vmax.f32 %v1277_v2, 0.0 }
 0x2b3   : > { %v1324_v11 = vpack.c.bf16 %v1307_v3, %v1306_v22 }
 0x2b5   : > { %1340 = vst [vmem:[%s2404_s10 + $0x70] sm:$0xff] %v1324_v11 }
 0x2b6   : > { %v1204_v24 = vpop.f32.mrf.mxu3 }
 0x2b7   : > { %v1268_v25 = vadd.f32 %v2414_v38, %v1204_v24 }
 0x2b9   : > { %v1300_v59 = vmax.f32 %v1268_v25, 0.0 }
 0x2bb   : > { %v1321_v28 = vpack.c.bf16 %v1301_v26, %v1300_v59 }
 0x2bd   : > { %1337 = vst [vmem:[%s2404_s10 + $0x58] sm:$0xff] %v1321_v28 }
 0x2be   : > { %v1206_v29 = vpop.f32.mrf.mxu3 }
 0x2bf   : > { %v1276_v30 = vadd.f32 %v2414_v38, %v1206_v29 }
 0x2c1   : > { %v1308_v31 = vmax.f32 %v1276_v30, 0.0 }
 0x2c3   : > { %v1325_v32 = vpack.c.bf16 %v1309_v10, %v1308_v31 }
 0x2c5   : > { %1341 = vst [vmem:[%s2404_s10 + $0x78] sm:$0xff] %v1325_v32 }
 0x2c6 PF: > { %s24_s30 = sadd.s32 1, %s2148_s30  }
 0x2c7   : > { %p21_p7 = scmp.ge.s32.totalorder %s24_s30, 6  }
 0x2c9   :  { %23 = sbr.rel (!%p21_p7) target bundleno = 5 (0x5), region = 119 }
 0x2ce   :  { %1366 = vsyncpa [#allocation3], 1 }
 0x2cf   :  { %1368 = vsyncpa [#allocation3 + $0x1], 1 }
 0x2d0   :  { %1369 = vsyncpa [#allocation5], 1 }
 0x2d1   :  { %1370 = vsyncpa [#allocation8], 1 }
 0x2d2   :  { %1371 = vsyncpa [#allocation11], 1 }
 0x2d3   :  { %1372 = vsyncpa [#allocation14], 1 }

// kernel: decoder_forward.1
= control target key start
LH: loop header
LB: loop body
LE: loop exit
PB: predicated region body
PF: predicated region fallthrough
CT: control target
= control target key end

     0   :  { %14 = vsyncpa [#allocation3], 0  ;;  %s2435_s0 = inlined_call_operand.vmem [shape: bf16[128,64], index: 0, kind: input, shape index: {}]   ;;  %s2436_s1 = inlined_call_operand.hbm [shape: bf16[64,128], index: 1, kind: input, shape index: {}]   ;;  %s2437_s2 = inlined_call_operand.hbm [shape: bf16[128,256], index: 2, kind: input, shape index: {}]   ;;  %s2438_s3 = inlined_call_operand.hbm [shape: bf16[128,256], index: 3, kind: input, shape index: {}]   ;;  %s2439_s4 = inlined_call_operand.hbm [shape: bf16[128,256], index: 4, kind: input, shape index: {}]   ;;  %s2440_s5 = inlined_call_operand.hbm [shape: f32[1,128], index: 5, kind: input, shape index: {}]   ;;  %s2441_s6 = inlined_call_operand.hbm [shape: f32[1,256], index: 6, kind: input, shape index: {}]   ;;  %s2442_s7 = inlined_call_operand.hbm [shape: f32[1,512], index: 7, kind: input, shape index: {}]   ;;  %s2443_s8 = inlined_call_operand.hbm [shape: f32[1,1024], index: 8, kind: input, shape index: {}]   ;;  %s2444_s9 = inlined_call_operand.vmem [shape: bf16[128,1024], index: 9, kind: output, shape index: {}]  }
   0x1   :  { %15 = vsyncpa [#allocation5], 0 }
   0x2   :  { %16 = vsyncpa [#allocation8], 0 }
   0x3   :  { %17 = vsyncpa [#allocation11], 0 }
   0x4   :  { %18 = vsyncpa [#allocation14], 0  ;;  %s2212_s30 = smov 0  }
   0x5 LB: > { %s274_s12 = sshll.u32 %s2437_s2, 4  ;;  %s2445_s13 = sadd.s32 4294967295, %s2148_s30   ;;  %s2148_s30 = sphi %s2212_s30, %s24_s30   ;;  %s275_s12 = int_to_ptr.hbm [resolvable:$true] %s274_s12 }
   0x6   : > { %p1481_p0 = scmp.ge.s32.totalorder %s2148_s30, 1  ;;  %p249_p1 = scmp.lt.s32.totalorder %s2148_s30, 5 }
   0x7   : > { %p2225_p2 = scmp.eq.s32.totalorder %s2445_s13, 0  ;;  %s2150_s16 = smov [#allocation4]  }
   0x8   : > { %p2229_p3 = pnand %p1481_p0, %p249_p1  ;;  %s276_s17 = sshll.u32 %s2150_s16, 4  ;;  %s277_s17 = int_to_ptr.vmem [resolvable:$true] %s276_s17 }
   0x9   : > { %s302_s20 = sshll.u32 %s2439_s4, 4  ;;  %s2151_s22 = smov [#allocation7]   ;;  %s303_s20 = int_to_ptr.hbm [resolvable:$true] %s302_s20 }
   0xa   : > { %p1820_p4 = pneg %p2229_p3  ;;  %s304_s23 = sshll.u32 %s2151_s22, 4  ;;  %s305_s23 = int_to_ptr.vmem [resolvable:$true] %s304_s23 }
   0xb   : > { %s329_s26 = sshll.u32 %s2441_s6, 4  ;;  %s2152_s27 = smov 128   ;;  %s330_s26 = int_to_ptr.hbm [resolvable:$true] %s329_s26 }
   0xc   : > { %p2240_p5 = pnand %p2225_p2, %p1820_p4  ;;  %s2153_s28 = smov 8  }
   0xd   : > { %s2154_s29 = smov [#allocation10]   ;;  %s260_s18 = sshll.u32 %s2436_s1, 4  ;;  %s261_s18 = int_to_ptr.hbm [resolvable:$true] %s260_s18 }
   0xe   : > { %1826 = dma.hbm_to_vmem [thread:$0]  (!%p2240_p5), %s275_s12, 2048, %s277_s17, [#allocation5], %s2152_s27, %s2152_s27, %s2153_s28  }
   0xf   : > { %1832 = dma.hbm_to_vmem [thread:$0]  (!%p2240_p5), %s303_s20, 2048, %s305_s23, [#allocation8], %s2152_s27, %s2152_s27, %s2153_s28  }
  0x10   : > { %s331_s10 = sshll.u32 %s2154_s29, 4  ;;  %s2155_s19 = smov [#allocation2]   ;;  %s332_s10 = int_to_ptr.vmem [resolvable:$true] %s331_s10 }
  0x11   : > { %1838 = dma.hbm_to_vmem [thread:$0]  (!%p2240_p5), %s330_s26, 32, %s332_s10, [#allocation11]  }
  0x12   : > { %s262_s22 = sshll.u32 %s2155_s19, 4  ;;  %s288_s12 = sshll.u32 %s2438_s3, 4  ;;  %s263_s22 = int_to_ptr.vmem [resolvable:$true] %s262_s22  ;;  %s289_s12 = int_to_ptr.hbm [resolvable:$true] %s288_s12 }
  0x13   : > { %s2156_s17 = smov 64   ;;  %s2157_s20 = smov 4  }
  0x14   : > { %1823 = dma.hbm_to_vmem [thread:$0]  (!%p2240_p5), %s261_s18, 512, %s263_s22, [#allocation3], %s2156_s17, %s2156_s17, %s2157_s20  }
  0x15   : > { %s2158_s23 = smov [#allocation6]   ;;  %s317_s26 = sshll.u32 %s2440_s5, 4  ;;  %s318_s26 = int_to_ptr.hbm [resolvable:$true] %s317_s26 }
  0x16   : > { %s290_s29 = sshll.u32 %s2158_s23, 4  ;;  %s341_s24 = sshll.u32 %s2442_s7, 4  ;;  %s291_s29 = int_to_ptr.vmem [resolvable:$true] %s290_s29  ;;  %s342_s24 = int_to_ptr.hbm [resolvable:$true] %s341_s24 }
  0x17   : > { %1829 = dma.hbm_to_vmem [thread:$0]  (!%p2240_p5), %s289_s12, 2048, %s291_s29, [#allocation5], %s2152_s27, %s2152_s27, %s2153_s28  }
  0x18   : > { %s2159_s25 = smov [#allocation9]   ;;  %s2160_s18 = smov [#allocation12]  }
  0x19   : > { %s319_s13 = sshll.u32 %s2159_s25, 4  ;;  %s343_s22 = sshll.u32 %s2160_s18, 4  ;;  %s320_s13 = int_to_ptr.vmem [resolvable:$true] %s319_s13  ;;  %s344_s22 = int_to_ptr.vmem [resolvable:$true] %s343_s22 }
  0x1a   : > { %1835 = dma.hbm_to_vmem [thread:$0]  (!%p2240_p5), %s318_s26, 16, %s320_s13, [#allocation8]  }
  0x1b   : > { %s353_s23 = sshll.u32 %s2443_s8, 4  ;;  %s2161_s27 = smov [#allocation13]   ;;  %s354_s23 = int_to_ptr.hbm [resolvable:$true] %s353_s23 }
  0x1c   : > { %1841 = dma.hbm_to_vmem [thread:$0]  (!%p2240_p5), %s342_s24, 64, %s344_s22, [#allocation11]  }
  0x1d   : > { %s355_s28 = sshll.u32 %s2161_s27, 4  ;;  %377 = sbr.rel (%p2229_p3) target bundleno = 710 (0x2c6), region = 56  ;;  %s356_s28 = int_to_ptr.vmem [resolvable:$true] %s355_s28 }
  0x1e   : > { %1844 = dma.hbm_to_vmem [thread:$0]  (!%p2240_p5), %s354_s23, 128, %s356_s28, [#allocation14]  }
  0x22   : > { %2127 = dma.done.wait (%p2225_p2), [#allocation3], 512  }
  0x23   : > { %2129 = vsyncadd (%p2225_p2), [#allocation3], 4294966784 }
  0x24   : > { %2131 = dma.done.wait (%p2225_p2), [#allocation5], 4096  }
  0x25   : > { %2133 = vsyncadd (%p2225_p2), [#allocation5], 4294963200 }
  0x26   : > { %2135 = dma.done.wait (%p2225_p2), [#allocation8], 2064  }
  0x27   : > { %2137 = vsyncadd (%p2225_p2), [#allocation8], 4294965232 }
  0x28   : > { %2139 = dma.done.wait (%p2225_p2), [#allocation11], 96  }
  0x29   : > { %2141 = vsyncadd (%p2225_p2), [#allocation11], 4294967200 }
  0x2a   : > { %2143 = dma.done.wait (%p2225_p2), [#allocation14], 128  }
  0x2b   : > { %2145 = vsyncadd (%p2225_p2), [#allocation14], 4294967168  ;;  %s2449_s13 = sadd.s32 4294967295, %s2148_s30   ;;  %v1731_v0 = vld [vmem:[#allocation2 + $0x18] sm:$0xff]  ;;  %v1730_v1 = vld [vmem:[#allocation2 + $0x10] sm:$0xff]  ;;  %vm514_vm0 = vcmask 523264  }
  0x2c   : > { %s1500_s15 = sshll.u32 %s2449_s13, 2  ;;  %525 = vmatpush.bf16.msra.mxu0 %v1731_v0  ;;  %v1589_v2 = vld [vmem:[#allocation4 + $0x70] sm:$0xf]  ;;  %v1747_v3 = vld [vmem:[#allocation4 + $0x74] sm:$0xf0]  ;;  %v1729_v13 = vld [vmem:[#allocation2 + $0x8] sm:$0xff] }
  0x2d   : > { %p451_p6 = scmp.lt.s32.totalorder %s1500_s15, 15  ;;  %v1746_v4 = vld [vmem:[#allocation4 + $0x74] sm:$0xf]  ;;  %v1590_v5 = vor.u32 %v1747_v3, %v1589_v2  ;;  %v1591_v6 = vld [vmem:[#allocation4 + $0x78] sm:$0xf0]  ;;  %v1728_v20 = vld [vmem:[#allocation2] sm:$0xff] }
  0x2e   : > { %v1581_v7 = vld [vmem:[#allocation4 + $0x60] sm:$0xf]  ;;  %v1745_v8 = vld [vmem:[#allocation4 + $0x64] sm:$0xf0]  ;;  %v1594_v9 = vor.u32 %v1746_v4, %v1591_v6  ;;  %v1744_v10 = vld [vmem:[#allocation4 + $0x64] sm:$0xf] }
  0x2f   : > { %s2451_s15 = smov (!%p451_p6, %s1500_s15), 15  ;;  %v1583_v11 = vld [vmem:[#allocation4 + $0x68] sm:$0xf0]  ;;  %648 = vmatpush.bf16.msra.mxu1 %v1590_v5  ;;  %v1582_v12 = vor.u32 %v1745_v8, %v1581_v7  ;;  %v1573_v15 = vld [vmem:[#allocation4 + $0x50] sm:$0xf] }
  0x30   : > { %526 = vmatpush.bf16.msra.mxu0 %v1730_v1  ;;  %s1501_s14 = sshll.u32 %s2451_s15, 2  ;;  %667 = vmatpush.bf16.msra.mxu2 %v1594_v9  ;;  %v1586_v14 = vor.u32 %v1744_v10, %v1583_v11  ;;  %v1743_v16 = vld [vmem:[#allocation4 + $0x54] sm:$0xf0]  ;;  %v1742_v17 = vld [vmem:[#allocation4 + $0x54] sm:$0xf]  ;;  %s1725_s11 = sshll.u32 %s2451_s15, 5 }
  0x31   : > { %v1575_v18 = vld [vmem:[#allocation4 + $0x58] sm:$0xf0]  ;;  %v1574_v19 = vor.u32 %v1743_v16, %v1573_v15  ;;  %s454_s29 = scalar_lea.vmem %s2435_s0, %s1501_s14  ;;  %v1565_v22 = vld [vmem:[#allocation4 + $0x40] sm:$0xf]  ;;  %v1741_v23 = vld [vmem:[#allocation4 + $0x44] sm:$0xf0]  ;;  %s2404_s10 = scalar_lea.vmem %s2444_s9, %s1725_s11 }
  0x32   : > { %v1578_v21 = vor.u32 %v1742_v17, %v1575_v18  ;;  %v1740_v24 = vld [vmem:[#allocation4 + $0x44] sm:$0xf]  ;;  %v1567_v25 = vld [vmem:[#allocation4 + $0x48] sm:$0xf0]  ;;  %v1566_v27 = vor.u32 %v1741_v23, %v1565_v22  ;;  %v1557_v30 = vld [vmem:[#allocation4 + $0x30] sm:$0xf] }
  0x33   : > { %649 = vmatpush.bf16.msra.mxu1 %v1582_v12  ;;  %v1726_v26 = vld [vmem:[%s454_s29] sm:$0xff]  ;;  %v1570_v28 = vor.u32 %v1740_v24, %v1567_v25  ;;  %v1727_v29 = vld [vmem:[%s454_s29 + $0x8] sm:$0xff]  ;;  %v1739_v31 = vld [vmem:[#allocation4 + $0x34] sm:$0xf0] }
  0x34   : > { %527 = vmatpush.bf16.msra.mxu0 %v1729_v13  ;;  %668 = vmatpush.bf16.msra.mxu2 %v1586_v14  ;;  %v1738_v32 = vld [vmem:[#allocation4 + $0x34] sm:$0xf]  ;;  %v1558_v33 = vor.u32 %v1739_v31, %v1557_v30  ;;  %v1559_v34 = vld [vmem:[#allocation4 + $0x38] sm:$0xf0]  ;;  %v1549_v36 = vld [vmem:[#allocation4 + $0x20] sm:$0xf] }
  0x35   : > { %v1562_v35 = vor.u32 %v1738_v32, %v1559_v34  ;;  %v1737_v37 = vld [vmem:[#allocation4 + $0x24] sm:$0xf0]  ;;  %v1736_v38 = vld [vmem:[#allocation4 + $0x24] sm:$0xf]  ;;  %v1551_v40 = vld [vmem:[#allocation4 + $0x28] sm:$0xf0] }
  0x36   : > { %v1550_v39 = vor.u32 %v1737_v37, %v1549_v36  ;;  %v1554_v41 = vor.u32 %v1736_v38, %v1551_v40  ;;  %v1541_v42 = vld [vmem:[#allocation4 + $0x10] sm:$0xf]  ;;  %v1735_v43 = vld [vmem:[#allocation4 + $0x14] sm:$0xf0]  ;;  %v1734_v44 = vld [vmem:[#allocation4 + $0x14] sm:$0xf] }
  0x37   : > { %650 = vmatpush.bf16.msra.mxu1 %v1574_v19  ;;  %v1542_v45 = vor.u32 %v1735_v43, %v1541_v42  ;;  %v1543_v46 = vld [vmem:[#allocation4 + $0x18] sm:$0xf0]  ;;  %v1533_v48 = vld [vmem:[#allocation4] sm:$0xf]  ;;  %v1733_v49 = vld [vmem:[#allocation4 + $0x4] sm:$0xf0] }
  0x38   : > { %528 = vmatpush.bf16.msra.mxu0 %v1728_v20  ;;  %669 = vmatpush.bf16.msra.mxu2 %v1578_v21  ;;  %v1546_v47 = vor.u32 %v1734_v44, %v1543_v46  ;;  %v1732_v50 = vld [vmem:[#allocation4 + $0x4] sm:$0xf]  ;;  %v1534_v51 = vor.u32 %v1733_v49, %v1533_v48  ;;  %v1535_v52 = vld [vmem:[#allocation4 + $0x8] sm:$0xf0]  ;;  %v1653_v54 = vld [vmem:[#allocation6 + $0x70] sm:$0xf] }
  0x39   : > { %v1538_v53 = vor.u32 %v1732_v50, %v1535_v52  ;;  %v1763_v55 = vld [vmem:[#allocation6 + $0x74] sm:$0xf0]  ;;  %v1762_v56 = vld [vmem:[#allocation6 + $0x74] sm:$0xf]  ;;  %v1655_v59 = vld [vmem:[#allocation6 + $0x78] sm:$0xf0] }
  0x3a   : > { %v1654_v58 = vor.u32 %v1763_v55, %v1653_v54  ;;  %v1645_v60 = vld [vmem:[#allocation6 + $0x60] sm:$0xf]  ;;  %v1761_v61 = vld [vmem:[#allocation6 + $0x64] sm:$0xf0]  ;;  %v1658_v62 = vor.u32 %v1762_v56, %v1655_v59  ;;  %v1760_v63 = vld [vmem:[#allocation6 + $0x64] sm:$0xf] }
  0x3b   : > { %1529 = vmatmul.msk.bf16.vlgmr.msra.gmra.mxu0 %vm514_vm0, %v1726_v26  ;;  %651 = vmatpush.bf16.msra.mxu1 %v1566_v27  ;;  %v1647_v0 = vld [vmem:[#allocation6 + $0x68] sm:$0xf0]  ;;  %v1646_v1 = vor.u32 %v1761_v61, %v1645_v60  ;;  %v1881_v2 = vld [vmem:[#allocation9] ss:$0 sm:$0xff]  ;;  %v1637_v17 = vld [vmem:[#allocation6 + $0x50] sm:$0xf] }
  0x3c   : > { %670 = vmatpush.bf16.msra.mxu2 %v1570_v28  ;;  %806 = vmatpush.bf16.msra.mxu3 %v1654_v58  ;;  %v1650_v3 = vor.u32 %v1760_v63, %v1647_v0  ;;  %v1759_v18 = vld [vmem:[#allocation6 + $0x54] sm:$0xf0]  ;;  %v1758_v19 = vld [vmem:[#allocation6 + $0x54] sm:$0xf]  ;;  %v1639_v21 = vld [vmem:[#allocation6 + $0x58] sm:$0xf0] }
  0x3d   : > { %825 = vmatpush.bf16.msrb.mxu0 %v1658_v62  ;;  %v1638_v20 = vor.u32 %v1759_v18, %v1637_v17  ;;  %v1642_v22 = vor.u32 %v1758_v19, %v1639_v21  ;;  %v1629_v23 = vld [vmem:[#allocation6 + $0x40] sm:$0xf]  ;;  %v1757_v24 = vld [vmem:[#allocation6 + $0x44] sm:$0xf0]  ;;  %v1756_v26 = vld [vmem:[#allocation6 + $0x44] sm:$0xf] }
  0x3e   : > { %v1630_v25 = vor.u32 %v1757_v24, %v1629_v23  ;;  %v1631_v27 = vld [vmem:[#allocation6 + $0x48] sm:$0xf0]  ;;  %v1755_v30 = vld [vmem:[#allocation6 + $0x34] sm:$0xf0]  ;;  %v1754_v31 = vld [vmem:[#allocation6 + $0x34] sm:$0xf] }
  0x3f   : > { %652 = vmatpush.bf16.msra.mxu1 %v1558_v33  ;;  %v1634_v28 = vor.u32 %v1756_v26, %v1631_v27  ;;  %v1623_v33 = vld [vmem:[#allocation6 + $0x38] sm:$0xf0]  ;;  %v1753_v36 = vld [vmem:[#allocation6 + $0x24] sm:$0xf0]  ;;  %v1752_v37 = vld [vmem:[#allocation6 + $0x24] sm:$0xf] }
  0x40   : > { %671 = vmatpush.bf16.msra.mxu2 %v1562_v35  ;;  %807 = vmatpush.bf16.msra.mxu3 %v1646_v1  ;;  %v1626_v34 = vor.u32 %v1754_v31, %v1623_v33  ;;  %v1613_v35 = vld [vmem:[#allocation6 + $0x20] sm:$0xf]  ;;  %v1751_v42 = vld [vmem:[#allocation6 + $0x14] sm:$0xf0]  ;;  %v1750_v43 = vld [vmem:[#allocation6 + $0x14] sm:$0xf] }
  0x41   : > { %826 = vmatpush.bf16.msrb.mxu0 %v1650_v3  ;;  %v1614_v38 = vor.u32 %v1753_v36, %v1613_v35  ;;  %v1749_v48 = vld [vmem:[#allocation6 + $0x4] sm:$0xf0]  ;;  %v1748_v49 = vld [vmem:[#allocation6 + $0x4] sm:$0xf]  ;;  %v562_v54 = vld [vmem:[#allocation10] sm:$0x3] }
  0x42   : > { %v565_v55 = vperm.slane %v562_v54, 1  ;;  %v1717_v60 = vld [vmem:[#allocation7 + $0x70] sm:$0xf]  ;;  %v1779_v61 = vld [vmem:[#allocation7 + $0x74] sm:$0xf0] }
  0x43   : > { %653 = vmatpush.bf16.msra.mxu1 %v1550_v39  ;;  %v1615_v39 = vld [vmem:[#allocation6 + $0x28] sm:$0xf0]  ;;  %v2308_v0 = vor.u32 %v1779_v61, %v1717_v60  ;;  %v1687_v60 = vld [vmem:[#allocation7 + $0x38] sm:$0xf0] }
  0x44   : > { %672 = vmatpush.bf16.msra.mxu2 %v1554_v41  ;;  %808 = vmatpush.bf16.msra.mxu3 %v1638_v20  ;;  %v1618_v40 = vor.u32 %v1752_v37, %v1615_v39  ;;  %v1605_v41 = vld [vmem:[#allocation6 + $0x10] sm:$0xf] }
  0x45   : > { %827 = vmatpush.bf16.msrb.mxu0 %v1642_v22  ;;  %v1606_v44 = vor.u32 %v1751_v42, %v1605_v41 }
  0x47   : > { %654 = vmatpush.bf16.msra.mxu1 %v1542_v45  ;;  %v1607_v45 = vld [vmem:[#allocation6 + $0x18] sm:$0xf0] }
  0x48   : > { %673 = vmatpush.bf16.msra.mxu2 %v1546_v47  ;;  %809 = vmatpush.bf16.msra.mxu3 %v1630_v25  ;;  %v1610_v46 = vor.u32 %v1750_v43, %v1607_v45  ;;  %v1597_v47 = vld [vmem:[#allocation6] sm:$0xf]  ;;  %v1775_v45 = vld [vmem:[#allocation7 + $0x54] sm:$0xf0] }
  0x49   : > { %828 = vmatpush.bf16.msrb.mxu0 %v1634_v28  ;;  %v1598_v50 = vor.u32 %v1749_v48, %v1597_v47  ;;  %v1774_v47 = vld [vmem:[#allocation7 + $0x54] sm:$0xf]  ;;  %v1703_v48 = vld [vmem:[#allocation7 + $0x58] sm:$0xf0] }
  0x4b   : > { %1530 = vmatmul.msk.bf16.gmra.mxu0 %vm514_vm0, %v1727_v29  ;;  %655 = vmatpush.bf16.msra.mxu1 %v1534_v51  ;;  %v1621_v29 = vld [vmem:[#allocation6 + $0x30] sm:$0xf]  ;;  %v1599_v51 = vld [vmem:[#allocation6 + $0x8] sm:$0xf0] }
  0x4c   : > { %674 = vmatpush.bf16.msra.mxu2 %v1538_v53  ;;  %v1622_v32 = vor.u32 %v1755_v30, %v1621_v29  ;;  %v1602_v52 = vor.u32 %v1748_v49, %v1599_v51  ;;  %v2326_v49 = vor.u32 %v1774_v47, %v1703_v48  ;;  %v1773_v51 = vld [vmem:[#allocation7 + $0x44] sm:$0xf0] }
  0x4d   : > { %829 = vmatpush.bf16.msrb.mxu0 %v1626_v34 }
  0x4e   : > { %810 = vmatpush.bf16.msra.mxu3 %v1622_v32 }
  0x4f   : > { %852 = vmatpush.bf16.msrb.mxu1 %v1654_v58 }
  0x50   : > { %871 = vmatpush.bf16.msrb.mxu2 %v1658_v62  ;;  %v1778_v62 = vld [vmem:[#allocation7 + $0x74] sm:$0xf] }
  0x51   : > { %830 = vmatpush.bf16.msrb.mxu0 %v1618_v40 }
  0x52   : > { %811 = vmatpush.bf16.msra.mxu3 %v1614_v38 }
  0x53   : > { %853 = vmatpush.bf16.msrb.mxu1 %v1646_v1  ;;  %v1719_v1 = vld [vmem:[#allocation7 + $0x78] sm:$0xf0] }
  0x54   : > { %872 = vmatpush.bf16.msrb.mxu2 %v1650_v3  ;;  %v2310_v3 = vor.u32 %v1778_v62, %v1719_v1  ;;  %v1677_v62 = vld [vmem:[#allocation7 + $0x20] sm:$0xf]  ;;  %v1768_v1 = vld [vmem:[#allocation7 + $0x24] sm:$0xf] }
  0x55   : > { %831 = vmatpush.bf16.msrb.mxu0 %v1610_v46 }
  0x56   : > { %812 = vmatpush.bf16.msra.mxu3 %v1606_v44 }
  0x57   : > { %854 = vmatpush.bf16.msrb.mxu1 %v1638_v20 }
  0x58   : > { %873 = vmatpush.bf16.msrb.mxu2 %v1642_v22 }
  0x59   : > { %832 = vmatpush.bf16.msrb.mxu0 %v1602_v52 }
  0x5a   : > { %813 = vmatpush.bf16.msra.mxu3 %v1598_v50 }
  0x5b   : > { %855 = vmatpush.bf16.msrb.mxu1 %v1630_v25 }
  0x5c   : > { %874 = vmatpush.bf16.msrb.mxu2 %v1634_v28 }
  0x5d   : > { %1067 = vmatpush.bf16.msra.mxu0 %v2310_v3 }
  0x5e   : > { %1048 = vmatpush.bf16.msrb.mxu3 %v2308_v0 }
  0x5f   : > { %856 = vmatpush.bf16.msrb.mxu1 %v1622_v32 }
  0x60   : > { %875 = vmatpush.bf16.msrb.mxu2 %v1626_v34 }
  0x63   : > { %857 = vmatpush.bf16.msrb.mxu1 %v1614_v38 }
  0x64   : > { %876 = vmatpush.bf16.msrb.mxu2 %v1618_v40 }
  0x67   : > { %858 = vmatpush.bf16.msrb.mxu1 %v1606_v44  ;;  %v1701_v44 = vld [vmem:[#allocation7 + $0x50] sm:$0xf] }
  0x68   : > { %877 = vmatpush.bf16.msrb.mxu2 %v1610_v46  ;;  %v2324_v46 = vor.u32 %v1775_v45, %v1701_v44 }
  0x6b   : > { %859 = vmatpush.bf16.msrb.mxu1 %v1598_v50  ;;  %v1693_v50 = vld [vmem:[#allocation7 + $0x40] sm:$0xf] }
  0x6c   : > { %878 = vmatpush.bf16.msrb.mxu2 %v1602_v52  ;;  %v1772_v52 = vld [vmem:[#allocation7 + $0x44] sm:$0xf] }
  0xb8   : > { %v530_v57 = vpop.f32.mrf.mxu0 }
  0xb9   : > { %v531_v4 = vadd.f32 %v1881_v2, %v530_v57  ;;  %v564_v57 = vperm.slane %v562_v54, 0  ;;  %v1695_v54 = vld [vmem:[#allocation7 + $0x48] sm:$0xf0] }
  0xbb   : > { %v540_v7 = vmax.f32 %v531_v4, 0.0  ;;  %v1777_v4 = vld [vmem:[#allocation7 + $0x64] sm:$0xf0] }
  0xc0   : > { %v532_v5 = vpop.f32.mrf.mxu0 }
  0xc1   : > { %v533_v6 = vadd.f32 %v1881_v2, %v532_v5  ;;  %v1776_v5 = vld [vmem:[#allocation7 + $0x64] sm:$0xf] }
  0xc3   : > { %v541_v8 = vmax.f32 %v533_v6, 0.0  ;;  %v1711_v6 = vld [vmem:[#allocation7 + $0x68] sm:$0xf0] }
  0xc5   : > { %v544_v9 = vpack.c.bf16 %v541_v8, %v540_v7 }
  0xc7   : > { %656 = vmatmul.bf16.vlgmr.msra.gmra.mxu1 %v544_v9  ;;  %675 = vmatmul.bf16.vlgmr.msra.gmra.mxu2 %v544_v9 }
  0xc8   : > { %v535_v10 = vpop.f32.mrf.mxu0  ;;  %1094 = vmatpush.bf16.msra.mxu1 %v2308_v0  ;;  %1113 = vmatpush.bf16.msra.mxu2 %v2310_v3 }
  0xc9   : > { %v536_v11 = vadd.f32 %v1881_v2, %v535_v10 }
  0xcb   : > { %v542_v14 = vmax.f32 %v536_v11, 0.0  ;;  %v2318_v11 = vor.u32 %v1776_v5, %v1711_v6  ;;  %v1669_v6 = vld [vmem:[#allocation7 + $0x10] sm:$0xf] }
  0xcd   : > { %1068 = vmatpush.bf16.msra.mxu0 %v2318_v11  ;;  %1114 = vmatpush.bf16.msra.mxu2 %v2318_v11 }
  0xd0   : > { %v537_v12 = vpop.f32.mrf.mxu0 }
  0xd1   : > { %v538_v13 = vadd.f32 %v1881_v2, %v537_v12  ;;  %v1709_v2 = vld [vmem:[#allocation7 + $0x60] sm:$0xf]  ;;  %1069 = vmatpush.bf16.msra.mxu0 %v2326_v49  ;;  %1115 = vmatpush.bf16.msra.mxu2 %v2326_v49 }
  0xd2   : > { %v2314_v9 = vor.u32 %v1777_v4, %v1709_v2  ;;  %v1679_v4 = vld [vmem:[#allocation7 + $0x28] sm:$0xf0] }
  0xd3   : > { %v543_v15 = vmax.f32 %v538_v13, 0.0  ;;  %v1682_v5 = vor.u32 %v1768_v1, %v1679_v4 }
  0xd4   : > { %1049 = vmatpush.bf16.msrb.mxu3 %v2314_v9  ;;  %1095 = vmatpush.bf16.msra.mxu1 %v2314_v9 }
  0xd5   : > { %v545_v16 = vpack.c.bf16 %v543_v15, %v542_v14 }
  0xd7   : > { %661 = vmatmul.bf16.gmra.mxu1 %v545_v16  ;;  %680 = vmatmul.bf16.gmra.mxu2 %v545_v16 }
  0xd8   : > { %1050 = vmatpush.bf16.msrb.mxu3 %v2324_v46  ;;  %1096 = vmatpush.bf16.msra.mxu1 %v2324_v46 }
 0x144   : > { %v657_v53 = vpop.f32.mrf.mxu1 }
 0x145   : > { %v658_v63 = vadd.f32 %v657_v53, %v564_v57  ;;  %v2332_v53 = vor.u32 %v1773_v51, %v1693_v50 }
 0x147   : > { %v686_v12 = vmax.f32 %v658_v63, 0.0  ;;  %1051 = vmatpush.bf16.msrb.mxu3 %v2332_v53  ;;  %1097 = vmatpush.bf16.msra.mxu1 %v2332_v53  ;;  %v1769_v63 = vld [vmem:[#allocation7 + $0x24] sm:$0xf0] }
 0x148   : > { %v2344_v2 = vor.u32 %v1769_v63, %v1677_v62 }
 0x14a   : > { %v676_v56 = vpop.f32.mrf.mxu2 }
 0x14b   : > { %v677_v59 = vadd.f32 %v676_v56, %v565_v55  ;;  %v1685_v56 = vld [vmem:[#allocation7 + $0x30] sm:$0xf] }
 0x14c   : > { %v659_v58 = vpop.f32.mrf.mxu1 }
 0x14d   : > { %v687_v7 = vmax.f32 %v677_v59, 0.0  ;;  %v660_v8 = vadd.f32 %v659_v58, %v564_v57  ;;  %v1770_v58 = vld [vmem:[#allocation7 + $0x34] sm:$0xf] }
 0x14e   : > { %v1690_v61 = vor.u32 %v1770_v58, %v1687_v60 }
 0x14f   : > { %v694_v15 = vpack.c.bf16 %v687_v7, %v686_v12  ;;  %v688_v16 = vmax.f32 %v660_v8, 0.0  ;;  %v1767_v7 = vld [vmem:[#allocation7 + $0x14] sm:$0xf0]  ;;  %v1766_v8 = vld [vmem:[#allocation7 + $0x14] sm:$0xf] }
 0x150   : > { %v1671_v12 = vld [vmem:[#allocation7 + $0x18] sm:$0xf0] }
 0x151   : > { %v844_v19 = vunpack.c.h.b16 %v694_v15  ;;  %v718_v21 = vunpack.c.l.b16 %v694_v15  ;;  %v1765_v15 = vld [vmem:[#allocation7 + $0x4] sm:$0xf0] }
 0x152   : > { %v678_v10 = vpop.f32.mrf.mxu2 }
 0x153   : > { %v679_v13 = vadd.f32 %v678_v10, %v565_v55  ;;  %v2348_v10 = vor.u32 %v1767_v7, %v1669_v6 }
 0x154   : > { %v662_v14 = vpop.f32.mrf.mxu1 }
 0x155   : > { %v689_v17 = vmax.f32 %v679_v13, 0.0  ;;  %v663_v28 = vadd.f32 %v662_v14, %v564_v57  ;;  %v1674_v13 = vor.u32 %v1766_v8, %v1671_v12  ;;  %v1661_v14 = vld [vmem:[#allocation7] sm:$0xf] }
 0x157   : > { %v695_v18 = vpack.c.bf16 %v689_v17, %v688_v16  ;;  %v690_v32 = vmax.f32 %v663_v28, 0.0  ;;  %v1764_v16 = vld [vmem:[#allocation7 + $0x4] sm:$0xf]  ;;  %v2352_v17 = vor.u32 %v1765_v15, %v1661_v14 }
 0x159   : > { %v845_v20 = vunpack.c.h.b16 %v695_v18  ;;  %v719_v22 = vunpack.c.l.b16 %v695_v18  ;;  %v1663_v18 = vld [vmem:[#allocation7 + $0x8] sm:$0xf0] }
 0x15a   : > { %v681_v23 = vpop.f32.mrf.mxu2 }
 0x15b   : > { %v722_v24 = vpack.c.b16 %v719_v22, %v718_v21  ;;  %v848_v25 = vpack.c.b16 %v845_v20, %v844_v19  ;;  %v682_v26 = vadd.f32 %v681_v23, %v565_v55  ;;  %v1666_v19 = vor.u32 %v1764_v16, %v1663_v18  ;;  %v2368_v21 = vld [vmem:[#allocation12] sm:$0xf] }
 0x15c   : > { %v664_v27 = vpop.f32.mrf.mxu1  ;;  %v895_v62 = vperm.slane %v2368_v21, 3 }
 0x15d   : > { %814 = vmatmul.bf16.vlgmr.msra.gmra.mxu3 %v722_v24  ;;  %833 = vmatmul.bf16.vlgmr.msrb.gmra.mxu0 %v722_v24  ;;  %v691_v29 = vmax.f32 %v682_v26, 0.0  ;;  %v665_v30 = vadd.f32 %v664_v27, %v564_v57  ;;  %v1771_v57 = vld [vmem:[#allocation7 + $0x34] sm:$0xf0] }
 0x15e   : > { %860 = vmatmul.bf16.vlgmr.msrb.gmra.mxu1 %v848_v25  ;;  %879 = vmatmul.bf16.vlgmr.msrb.gmra.mxu2 %v848_v25  ;;  %v2340_v59 = vor.u32 %v1771_v57, %v1685_v56 }
 0x15f   : > { %v696_v34 = vpack.c.bf16 %v691_v29, %v690_v32  ;;  %v692_v35 = vmax.f32 %v665_v30, 0.0 }
 0x160   : > { %1052 = vmatpush.bf16.msrb.mxu3 %v2340_v59  ;;  %1098 = vmatpush.bf16.msra.mxu1 %v2340_v59 }
 0x161   : > { %v720_v38 = vunpack.c.l.b16 %v696_v34  ;;  %v846_v40 = vunpack.c.h.b16 %v696_v34 }
 0x162   : > { %v683_v31 = vpop.f32.mrf.mxu2 }
 0x163   : > { %v684_v33 = vadd.f32 %v683_v31, %v565_v55  ;;  %v2334_v55 = vor.u32 %v1772_v52, %v1695_v54 }
 0x164   : > { %1053 = vmatpush.bf16.msrb.mxu3 %v2344_v2  ;;  %1099 = vmatpush.bf16.msra.mxu1 %v2344_v2 }
 0x165   : > { %v693_v36 = vmax.f32 %v684_v33, 0.0  ;;  %1070 = vmatpush.bf16.msra.mxu0 %v2334_v55  ;;  %1116 = vmatpush.bf16.msra.mxu2 %v2334_v55 }
 0x167   : > { %v697_v37 = vpack.c.bf16 %v693_v36, %v692_v35 }
 0x168   : > { %1054 = vmatpush.bf16.msrb.mxu3 %v2348_v10  ;;  %1100 = vmatpush.bf16.msra.mxu1 %v2348_v10 }
 0x169   : > { %v721_v39 = vunpack.c.l.b16 %v697_v37  ;;  %v847_v41 = vunpack.c.h.b16 %v697_v37  ;;  %1071 = vmatpush.bf16.msra.mxu0 %v1690_v61  ;;  %1117 = vmatpush.bf16.msra.mxu2 %v1690_v61 }
 0x16b   : > { %v723_v42 = vpack.c.b16 %v721_v39, %v720_v38  ;;  %v849_v43 = vpack.c.b16 %v847_v41, %v846_v40 }
 0x16c   : > { %1055 = vmatpush.bf16.msrb.mxu3 %v2352_v17  ;;  %1101 = vmatpush.bf16.msra.mxu1 %v2352_v17 }
 0x16d   : > { %819 = vmatmul.bf16.gmra.mxu3 %v723_v42  ;;  %838 = vmatmul.bf16.gmra.mxu0 %v723_v42 }
 0x16e   : > { %865 = vmatmul.bf16.gmra.mxu1 %v849_v43  ;;  %884 = vmatmul.bf16.gmra.mxu2 %v849_v43 }
 0x16f   : > { %1072 = vmatpush.bf16.msra.mxu0 %v1682_v5  ;;  %1118 = vmatpush.bf16.msra.mxu2 %v1682_v5 }
 0x170   : > { %1144 = vmatpush.bf16.msra.mxu3 %v2308_v0  ;;  %1190 = vmatpush.bf16.msrb.mxu1 %v2308_v0 }
 0x173   : > { %1073 = vmatpush.bf16.msra.mxu0 %v1674_v13  ;;  %1119 = vmatpush.bf16.msra.mxu2 %v1674_v13 }
 0x174   : > { %1145 = vmatpush.bf16.msra.mxu3 %v2314_v9  ;;  %1191 = vmatpush.bf16.msrb.mxu1 %v2314_v9 }
 0x177   : > { %1074 = vmatpush.bf16.msra.mxu0 %v1666_v19  ;;  %1120 = vmatpush.bf16.msra.mxu2 %v1666_v19 }
 0x178   : > { %1146 = vmatpush.bf16.msra.mxu3 %v2324_v46  ;;  %1192 = vmatpush.bf16.msrb.mxu1 %v2324_v46 }
 0x17b   : > { %1163 = vmatpush.bf16.msrb.mxu0 %v2310_v3  ;;  %1209 = vmatpush.bf16.msrb.mxu2 %v2310_v3  ;;  %v892_v3 = vperm.slane %v2368_v21, 0 }
 0x17c   : > { %1147 = vmatpush.bf16.msra.mxu3 %v2332_v53  ;;  %1193 = vmatpush.bf16.msrb.mxu1 %v2332_v53 }
 0x17f   : > { %1164 = vmatpush.bf16.msrb.mxu0 %v2318_v11  ;;  %1210 = vmatpush.bf16.msrb.mxu2 %v2318_v11  ;;  %v893_v11 = vperm.slane %v2368_v21, 1 }
 0x180   : > { %1148 = vmatpush.bf16.msra.mxu3 %v2340_v59  ;;  %1194 = vmatpush.bf16.msrb.mxu1 %v2340_v59 }
 0x183   : > { %1165 = vmatpush.bf16.msrb.mxu0 %v2326_v49  ;;  %1211 = vmatpush.bf16.msrb.mxu2 %v2326_v49 }
 0x184   : > { %1149 = vmatpush.bf16.msra.mxu3 %v2344_v2  ;;  %1195 = vmatpush.bf16.msrb.mxu1 %v2344_v2 }
 0x187   : > { %1166 = vmatpush.bf16.msrb.mxu0 %v2334_v55  ;;  %1212 = vmatpush.bf16.msrb.mxu2 %v2334_v55 }
 0x188   : > { %1150 = vmatpush.bf16.msra.mxu3 %v2348_v10  ;;  %1196 = vmatpush.bf16.msrb.mxu1 %v2348_v10 }
 0x18b   : > { %1167 = vmatpush.bf16.msrb.mxu0 %v1690_v61  ;;  %1213 = vmatpush.bf16.msrb.mxu2 %v1690_v61 }
 0x18c   : > { %1151 = vmatpush.bf16.msra.mxu3 %v2352_v17  ;;  %1197 = vmatpush.bf16.msrb.mxu1 %v2352_v17 }
 0x18f   : > { %1168 = vmatpush.bf16.msrb.mxu0 %v1682_v5  ;;  %1214 = vmatpush.bf16.msrb.mxu2 %v1682_v5  ;;  %v894_v5 = vperm.slane %v2368_v21, 2 }
 0x193   : > { %1169 = vmatpush.bf16.msrb.mxu0 %v1674_v13  ;;  %1215 = vmatpush.bf16.msrb.mxu2 %v1674_v13 }
 0x197   : > { %1170 = vmatpush.bf16.msrb.mxu0 %v1666_v19  ;;  %1216 = vmatpush.bf16.msrb.mxu2 %v1666_v19 }
 0x1da   : > { %v834_v20 = vpop.f32.mrf.mxu0 }
 0x1db   : > { %v901_v25 = vadd.f32 %v893_v11, %v834_v20  ;;  %v861_v44 = vpop.f32.mrf.mxu1 }
 0x1dd   : > { %v917_v29 = vmax.f32 %v901_v25, 0.0 }
 0x1e0   : > { %v815_v22 = vpop.f32.mrf.mxu3 }
 0x1e1   : > { %v900_v24 = vadd.f32 %v892_v3, %v815_v22  ;;  %v880_v40 = vpop.f32.mrf.mxu2 }
 0x1e2   : > { %v836_v23 = vpop.f32.mrf.mxu0 }
 0x1e3   : > { %v916_v26 = vmax.f32 %v900_v24, 0.0  ;;  %v905_v27 = vadd.f32 %v893_v11, %v836_v23  ;;  %v863_v60 = vpop.f32.mrf.mxu1 }
 0x1e4   : > { %v906_v12 = vadd.f32 %v894_v5, %v863_v60 }
 0x1e5   : > { %v932_v32 = vpack.c.bf16 %v917_v29, %v916_v26  ;;  %v921_v33 = vmax.f32 %v905_v27, 0.0 }
 0x1e6   : > { %v922_v18 = vmax.f32 %v906_v12, 0.0 }
 0x1e7   : > { %v960_v36 = vunpack.c.l.b16 %v932_v32  ;;  %v1086_v37 = vunpack.c.h.b16 %v932_v32 }
 0x1e8   : > { %v817_v28 = vpop.f32.mrf.mxu3 }
 0x1e9   : > { %v904_v30 = vadd.f32 %v892_v3, %v817_v28  ;;  %v882_v55 = vpop.f32.mrf.mxu2 }
 0x1ea   : > { %v839_v31 = vpop.f32.mrf.mxu0  ;;  %v907_v6 = vadd.f32 %v895_v62, %v882_v55 }
 0x1eb   : > { %v920_v34 = vmax.f32 %v904_v30, 0.0  ;;  %v909_v48 = vadd.f32 %v893_v11, %v839_v31  ;;  %v866_v15 = vpop.f32.mrf.mxu1 }
 0x1ec   : > { %v923_v14 = vmax.f32 %v907_v6, 0.0 }
 0x1ed   : > { %v934_v35 = vpack.c.bf16 %v921_v33, %v920_v34  ;;  %v925_v52 = vmax.f32 %v909_v48, 0.0 }
 0x1ee   : > { %v935_v20 = vpack.c.bf16 %v923_v14, %v922_v18 }
 0x1ef   : > { %v961_v38 = vunpack.c.l.b16 %v934_v35  ;;  %v1087_v39 = vunpack.c.h.b16 %v934_v35 }
 0x1f0   : > { %v820_v41 = vpop.f32.mrf.mxu3 }
 0x1f1   : > { %v1090_v42 = vpack.c.b16 %v1087_v39, %v1086_v37  ;;  %v964_v43 = vpack.c.b16 %v961_v38, %v960_v36  ;;  %v908_v45 = vadd.f32 %v892_v3, %v820_v41  ;;  %v885_v13 = vpop.f32.mrf.mxu2  ;;  %v2394_v39 = vld [vmem:[#allocation13] sm:$0xff] }
 0x1f2   : > { %v841_v47 = vpop.f32.mrf.mxu0  ;;  %v911_v27 = vadd.f32 %v895_v62, %v885_v13  ;;  %v1231_v41 = vperm.slane %v2394_v39, 1 }
 0x1f3   : > { %1056 = vmatmul.bf16.vlgmr.msrb.gmra.mxu3 %v964_v43  ;;  %1075 = vmatmul.bf16.vlgmr.msra.gmra.mxu0 %v964_v43  ;;  %v924_v49 = vmax.f32 %v908_v45, 0.0  ;;  %v913_v50 = vadd.f32 %v893_v11, %v841_v47  ;;  %v868_v24 = vpop.f32.mrf.mxu1  ;;  %v1232_v43 = vperm.slane %v2394_v39, 2  ;;  %v1233_v45 = vperm.slane %v2394_v39, 3 }
 0x1f4   : > { %1102 = vmatmul.bf16.vlgmr.msra.gmra.mxu1 %v1090_v42  ;;  %1121 = vmatmul.bf16.vlgmr.msra.gmra.mxu2 %v1090_v42  ;;  %v914_v28 = vadd.f32 %v894_v5, %v868_v24  ;;  %v927_v30 = vmax.f32 %v911_v27, 0.0 }
 0x1f5   : > { %1780 = vmatpush.bf16.msrb.mxu3 %v2308_v0  ;;  %v936_v56 = vpack.c.bf16 %v925_v52, %v924_v49  ;;  %v929_v57 = vmax.f32 %v913_v50, 0.0 }
 0x1f7   : > { %v962_v63 = vunpack.c.l.b16 %v936_v56  ;;  %v1088_v0 = vunpack.c.h.b16 %v936_v56 }
 0x1f8   : > { %v822_v51 = vpop.f32.mrf.mxu3 }
 0x1f9   : > { %v912_v54 = vadd.f32 %v892_v3, %v822_v51  ;;  %1781 = vmatpush.bf16.msrb.mxu3 %v2314_v9  ;;  %v903_v9 = vadd.f32 %v895_v62, %v880_v40  ;;  %v1183_v3 = vunpack.c.h.b16 %v935_v20  ;;  %v887_v22 = vpop.f32.mrf.mxu2 }
 0x1fa   : > { %v915_v26 = vadd.f32 %v895_v62, %v887_v22 }
 0x1fb   : > { %v928_v58 = vmax.f32 %v912_v54, 0.0  ;;  %v919_v16 = vmax.f32 %v903_v9, 0.0 }
 0x1fc   : > { %v931_v29 = vmax.f32 %v915_v26, 0.0 }
 0x1fd   : > { %v938_v61 = vpack.c.bf16 %v929_v57, %v928_v58  ;;  %1782 = vmatpush.bf16.msrb.mxu3 %v2324_v46  ;;  %v902_v46 = vadd.f32 %v894_v5, %v861_v44  ;;  %v1230_v44 = vperm.slane %v2394_v39, 0 }
 0x1ff   : > { %v963_v1 = vunpack.c.l.b16 %v938_v61  ;;  %v1089_v4 = vunpack.c.h.b16 %v938_v61  ;;  %v918_v19 = vmax.f32 %v902_v46, 0.0 }
 0x201   : > { %v965_v7 = vpack.c.b16 %v963_v1, %v962_v63  ;;  %v1091_v8 = vpack.c.b16 %v1089_v4, %v1088_v0  ;;  %1783 = vmatpush.bf16.msrb.mxu3 %v2332_v53  ;;  %v933_v21 = vpack.c.bf16 %v919_v16, %v918_v19  ;;  %v1137_v53 = vunpack.c.l.b16 %v935_v20 }
 0x203   : > { %1061 = vmatmul.bf16.gmra.mxu3 %v965_v7  ;;  %1080 = vmatmul.bf16.gmra.mxu0 %v965_v7  ;;  %v1136_v11 = vunpack.c.l.b16 %v933_v21  ;;  %v1182_v23 = vunpack.c.h.b16 %v933_v21 }
 0x204   : > { %1107 = vmatmul.bf16.gmra.mxu1 %v1091_v8  ;;  %1126 = vmatmul.bf16.gmra.mxu2 %v1091_v8 }
 0x205   : > { %1784 = vmatpush.bf16.msrb.mxu3 %v2340_v59  ;;  %v1140_v25 = vpack.c.b16 %v1137_v53, %v1136_v11  ;;  %v1186_v59 = vpack.c.b16 %v1183_v3, %v1182_v23 }
 0x209   : > { %1785 = vmatpush.bf16.msrb.mxu3 %v2344_v2  ;;  %v910_v2 = vadd.f32 %v894_v5, %v866_v15 }
 0x20b   : > { %v926_v31 = vmax.f32 %v910_v2, 0.0 }
 0x20d   : > { %1786 = vmatpush.bf16.msrb.mxu3 %v2348_v10  ;;  %v930_v10 = vmax.f32 %v914_v28, 0.0  ;;  %v937_v33 = vpack.c.bf16 %v927_v30, %v926_v31 }
 0x20f   : > { %v939_v32 = vpack.c.bf16 %v931_v29, %v930_v10  ;;  %v1138_v36 = vunpack.c.l.b16 %v937_v33  ;;  %v1184_v37 = vunpack.c.h.b16 %v937_v33 }
 0x211   : > { %1787 = vmatpush.bf16.msrb.mxu3 %v2352_v17  ;;  %v1139_v34 = vunpack.c.l.b16 %v939_v32  ;;  %v1185_v35 = vunpack.c.h.b16 %v939_v32 }
 0x213   : > { %1152 = vmatmul.bf16.vlgmr.msra.gmra.mxu3 %v1140_v25  ;;  %1171 = vmatmul.bf16.vlgmr.msrb.gmra.mxu0 %v1140_v25  ;;  %v1141_v38 = vpack.c.b16 %v1139_v34, %v1138_v36  ;;  %v1187_v17 = vpack.c.b16 %v1185_v35, %v1184_v37  ;;  %v1235_v34 = vperm.slane %v2394_v39, 5 }
 0x214   : > { %1198 = vmatmul.bf16.vlgmr.msrb.gmra.mxu1 %v1186_v59  ;;  %1217 = vmatmul.bf16.vlgmr.msrb.gmra.mxu2 %v1186_v59 }
 0x223   : > { %1157 = vmatmul.bf16.gmra.mxu3 %v1141_v38  ;;  %1176 = vmatmul.bf16.gmra.mxu0 %v1141_v38  ;;  %v2414_v38 = vperm.slane %v2394_v39, 6 }
 0x224   : > { %1222 = vmatmul.bf16.gmra.mxu2 %v1187_v17 }
 0x233   : > { %1203 = vmatmul.bf16.vlgmr.msrb.gmra.mxu3 %v1187_v17 }
 0x270   : > { %v1076_v40 = vpop.f32.mrf.mxu0 }
 0x271   : > { %v1103_v42 = vpop.f32.mrf.mxu1  ;;  %v1247_v47 = vadd.f32 %v1231_v41, %v1076_v40  ;;  %v1234_v40 = vperm.slane %v2394_v39, 4 }
 0x272   : > { %v1248_v48 = vadd.f32 %v1232_v43, %v1103_v42  ;;  %v1237_v42 = vperm.slane %v2394_v39, 7 }
 0x273   : > { %v1279_v55 = vmax.f32 %v1247_v47, 0.0 }
 0x274   : > { %v1280_v58 = vmax.f32 %v1248_v48, 0.0 }
 0x276   : > { %v1057_v49 = vpop.f32.mrf.mxu3 }
 0x277   : > { %v1246_v50 = vadd.f32 %v1230_v44, %v1057_v49  ;;  %v1122_v51 = vpop.f32.mrf.mxu2 }
 0x278   : > { %v1249_v52 = vadd.f32 %v1233_v45, %v1122_v51  ;;  %v1078_v54 = vpop.f32.mrf.mxu0 }
 0x279   : > { %v1278_v56 = vmax.f32 %v1246_v50, 0.0  ;;  %v1105_v57 = vpop.f32.mrf.mxu1  ;;  %v1255_v63 = vadd.f32 %v1231_v41, %v1078_v54 }
 0x27a   : > { %v1281_v60 = vmax.f32 %v1249_v52, 0.0  ;;  %v1256_v1 = vadd.f32 %v1232_v43, %v1105_v57 }
 0x27b   : > { %v1310_v61 = vpack.c.bf16 %v1279_v55, %v1278_v56  ;;  %v1287_v8 = vmax.f32 %v1255_v63, 0.0 }
 0x27c   : > { %v1311_v62 = vpack.c.bf16 %v1281_v60, %v1280_v58  ;;  %v1288_v13 = vmax.f32 %v1256_v1, 0.0 }
 0x27d   : > { %1326 = vst [vmem:[%s2404_s10] sm:$0xff] %v1310_v61 }
 0x27e   : > { %1327 = vst [vmem:[%s2404_s10 + $0x8] sm:$0xff] %v1311_v62  ;;  %v1059_v0 = vpop.f32.mrf.mxu3 }
 0x27f   : > { %v1254_v4 = vadd.f32 %v1230_v44, %v1059_v0  ;;  %v1124_v5 = vpop.f32.mrf.mxu2 }
 0x280   : > { %v1257_v6 = vadd.f32 %v1233_v45, %v1124_v5  ;;  %v1081_v7 = vpop.f32.mrf.mxu0 }
 0x281   : > { %v1286_v9 = vmax.f32 %v1254_v4, 0.0  ;;  %v1108_v12 = vpop.f32.mrf.mxu1  ;;  %v1263_v16 = vadd.f32 %v1231_v41, %v1081_v7 }
 0x282   : > { %v1289_v46 = vmax.f32 %v1257_v6, 0.0  ;;  %v1264_v18 = vadd.f32 %v1232_v43, %v1108_v12 }
 0x283   : > { %v1314_v14 = vpack.c.bf16 %v1287_v8, %v1286_v9  ;;  %v1295_v22 = vmax.f32 %v1263_v16, 0.0 }
 0x284   : > { %v1315_v15 = vpack.c.bf16 %v1289_v46, %v1288_v13  ;;  %v1296_v24 = vmax.f32 %v1264_v18, 0.0 }
 0x285   : > { %1330 = vst [vmem:[%s2404_s10 + $0x20] sm:$0xff] %v1314_v14 }
 0x286   : > { %1331 = vst [vmem:[%s2404_s10 + $0x28] sm:$0xff] %v1315_v15  ;;  %v1062_v19 = vpop.f32.mrf.mxu3 }
 0x287   : > { %v1262_v20 = vadd.f32 %v1230_v44, %v1062_v19  ;;  %v1127_v21 = vpop.f32.mrf.mxu2 }
 0x288   : > { %v1265_v53 = vadd.f32 %v1233_v45, %v1127_v21  ;;  %v1083_v3 = vpop.f32.mrf.mxu0 }
 0x289   : > { %v1294_v11 = vmax.f32 %v1262_v20, 0.0  ;;  %v1110_v23 = vpop.f32.mrf.mxu1  ;;  %v1271_v27 = vadd.f32 %v1231_v41, %v1083_v3 }
 0x28a   : > { %v1297_v25 = vmax.f32 %v1265_v53, 0.0  ;;  %v1272_v28 = vadd.f32 %v1232_v43, %v1110_v23 }
 0x28b   : > { %v1318_v26 = vpack.c.bf16 %v1295_v22, %v1294_v11  ;;  %v1303_v32 = vmax.f32 %v1271_v27, 0.0 }
 0x28c   : > { %v1319_v59 = vpack.c.bf16 %v1297_v25, %v1296_v24  ;;  %v1304_v36 = vmax.f32 %v1272_v28, 0.0 }
 0x28d   : > { %1334 = vst [vmem:[%s2404_s10 + $0x40] sm:$0xff] %v1318_v26 }
 0x28e   : > { %1335 = vst [vmem:[%s2404_s10 + $0x48] sm:$0xff] %v1319_v59  ;;  %v1064_v2 = vpop.f32.mrf.mxu3 }
 0x28f   : > { %v1270_v29 = vadd.f32 %v1230_v44, %v1064_v2  ;;  %v1129_v30 = vpop.f32.mrf.mxu2 }
 0x290   : > { %v1273_v10 = vadd.f32 %v1233_v45, %v1129_v30  ;;  %v1172_v31 = vpop.f32.mrf.mxu0 }
 0x291   : > { %v1302_v33 = vmax.f32 %v1270_v29, 0.0  ;;  %v1199_v35 = vpop.f32.mrf.mxu1  ;;  %v1251_v43 = vadd.f32 %v1235_v34, %v1172_v31 }
 0x292   : > { %v1305_v37 = vmax.f32 %v1273_v10, 0.0  ;;  %v1252_v44 = vadd.f32 %v2414_v38, %v1199_v35 }
 0x293   : > { %v1322_v17 = vpack.c.bf16 %v1303_v32, %v1302_v33  ;;  %v1283_v51 = vmax.f32 %v1251_v43, 0.0 }
 0x294   : > { %v1323_v41 = vpack.c.bf16 %v1305_v37, %v1304_v36  ;;  %v1284_v54 = vmax.f32 %v1252_v44, 0.0 }
 0x295   : > { %1338 = vst [vmem:[%s2404_s10 + $0x60] sm:$0xff] %v1322_v17 }
 0x296   : > { %1339 = vst [vmem:[%s2404_s10 + $0x68] sm:$0xff] %v1323_v41  ;;  %v1153_v45 = vpop.f32.mrf.mxu3 }
 0x297   : > { %v1250_v47 = vadd.f32 %v1234_v40, %v1153_v45  ;;  %v1218_v48 = vpop.f32.mrf.mxu2 }
 0x298   : > { %v1253_v49 = vadd.f32 %v1237_v42, %v1218_v48  ;;  %v1174_v50 = vpop.f32.mrf.mxu0 }
 0x299   : > { %v1282_v52 = vmax.f32 %v1250_v47, 0.0  ;;  %v1201_v57 = vpop.f32.mrf.mxu1  ;;  %v1259_v39 = vadd.f32 %v1235_v34, %v1174_v50 }
 0x29a   : > { %v1285_v55 = vmax.f32 %v1253_v49, 0.0  ;;  %v1260_v60 = vadd.f32 %v2414_v38, %v1201_v57 }
 0x29b   : > { %v1312_v56 = vpack.c.bf16 %v1283_v51, %v1282_v52  ;;  %v1291_v4 = vmax.f32 %v1259_v39, 0.0 }
 0x29c   : > { %v1313_v58 = vpack.c.bf16 %v1285_v55, %v1284_v54  ;;  %v1292_v6 = vmax.f32 %v1260_v60, 0.0 }
 0x29d   : > { %1328 = vst [vmem:[%s2404_s10 + $0x10] sm:$0xff] %v1312_v56 }
 0x29e   : > { %1329 = vst [vmem:[%s2404_s10 + $0x18] sm:$0xff] %v1313_v58  ;;  %v1155_v61 = vpop.f32.mrf.mxu3 }
 0x29f   : > { %v1258_v62 = vadd.f32 %v1234_v40, %v1155_v61  ;;  %v1220_v63 = vpop.f32.mrf.mxu2 }
 0x2a0   : > { %v1261_v1 = vadd.f32 %v1237_v42, %v1220_v63  ;;  %v1177_v0 = vpop.f32.mrf.mxu0 }
 0x2a1   : > { %v1290_v5 = vmax.f32 %v1258_v62, 0.0  ;;  %v1267_v12 = vadd.f32 %v1235_v34, %v1177_v0 }
 0x2a2   : > { %v1293_v7 = vmax.f32 %v1261_v1, 0.0 }
 0x2a3   : > { %v1316_v8 = vpack.c.bf16 %v1291_v4, %v1290_v5  ;;  %v1299_v14 = vmax.f32 %v1267_v12, 0.0 }
 0x2a4   : > { %v1317_v9 = vpack.c.bf16 %v1293_v7, %v1292_v6 }
 0x2a5   : > { %1332 = vst [vmem:[%s2404_s10 + $0x30] sm:$0xff] %v1316_v8 }
 0x2a6   : > { %1333 = vst [vmem:[%s2404_s10 + $0x38] sm:$0xff] %v1317_v9  ;;  %v1158_v13 = vpop.f32.mrf.mxu3 }
 0x2a7   : > { %v1266_v46 = vadd.f32 %v1234_v40, %v1158_v13  ;;  %v1223_v53 = vpop.f32.mrf.mxu2 }
 0x2a8   : > { %v1179_v16 = vpop.f32.mrf.mxu0  ;;  %v1269_v23 = vadd.f32 %v1237_v42, %v1223_v53 }
 0x2a9   : > { %v1298_v15 = vmax.f32 %v1266_v46, 0.0  ;;  %v1275_v19 = vadd.f32 %v1235_v34, %v1179_v16 }
 0x2aa   : > { %v1301_v26 = vmax.f32 %v1269_v23, 0.0 }
 0x2ab   : > { %v1320_v18 = vpack.c.bf16 %v1299_v14, %v1298_v15  ;;  %v1307_v3 = vmax.f32 %v1275_v19, 0.0 }
 0x2ad   : > { %1336 = vst [vmem:[%s2404_s10 + $0x50] sm:$0xff] %v1320_v18 }
 0x2ae   : > { %v1160_v20 = vpop.f32.mrf.mxu3 }
 0x2af   : > { %v1274_v21 = vadd.f32 %v1234_v40, %v1160_v20  ;;  %v1225_v27 = vpop.f32.mrf.mxu2 }
 0x2b0   : > { %v1277_v2 = vadd.f32 %v1237_v42, %v1225_v27 }
 0x2b1   : > { %v1306_v22 = vmax.f32 %v1274_v21, 0.0 }
 0x2b2   : > { %v1309_v10 = vmax.f32 %v1277_v2, 0.0 }
 0x2b3   : > { %v1324_v11 = vpack.c.bf16 %v1307_v3, %v1306_v22 }
 0x2b5   : > { %1340 = vst [vmem:[%s2404_s10 + $0x70] sm:$0xff] %v1324_v11 }
 0x2b6   : > { %v1204_v24 = vpop.f32.mrf.mxu3 }
 0x2b7   : > { %v1268_v25 = vadd.f32 %v2414_v38, %v1204_v24 }
 0x2b9   : > { %v1300_v59 = vmax.f32 %v1268_v25, 0.0 }
 0x2bb   : > { %v1321_v28 = vpack.c.bf16 %v1301_v26, %v1300_v59 }
 0x2bd   : > { %1337 = vst [vmem:[%s2404_s10 + $0x58] sm:$0xff] %v1321_v28 }
 0x2be   : > { %v1206_v29 = vpop.f32.mrf.mxu3 }
 0x2bf   : > { %v1276_v30 = vadd.f32 %v2414_v38, %v1206_v29 }
 0x2c1   : > { %v1308_v31 = vmax.f32 %v1276_v30, 0.0 }
 0x2c3   : > { %v1325_v32 = vpack.c.bf16 %v1309_v10, %v1308_v31 }
 0x2c5   : > { %1341 = vst [vmem:[%s2404_s10 + $0x78] sm:$0xff] %v1325_v32 }
 0x2c6 PF: > { %s24_s30 = sadd.s32 1, %s2148_s30  }
 0x2c7   : > { %p21_p7 = scmp.ge.s32.totalorder %s24_s30, 6  }
 0x2c9   :  { %23 = sbr.rel (!%p21_p7) target bundleno = 5 (0x5), region = 119 }
 0x2ce   :  { %1366 = vsyncpa [#allocation3], 1 }
 0x2cf   :  { %1368 = vsyncpa [#allocation3 + $0x1], 1 }
 0x2d0   :  { %1369 = vsyncpa [#allocation5], 1 }
 0x2d1   :  { %1370 = vsyncpa [#allocation8], 1 }
 0x2d2   :  { %1371 = vsyncpa [#allocation11], 1 }
 0x2d3   :  { %1372 = vsyncpa [#allocation14], 1 }

</bundles_post_ra>
